<compile_context>
chip_gen: v7x
topology: tpu7x:2x2x1
jax: 0.10.0
libtpu: 0.0.40
codegen_flags: <defaults>
</compile_context>

<pallas_src>
import functools

import jax
import jax.numpy as jnp
from jax import lax
from jax.experimental import pallas as pl
from jax.experimental.pallas import tpu as pltpu

DEFAULT_ALIF_TAU_ADP = 20.0
DEFAULT_ALIF_TAU_M = 20.0
DEFAULT_ALIF_BETA = 1.8
DEFAULT_ALIF_THETA = 0.01


def _round_up(x: int, m: int) -> int:
    return ((x + m - 1) // m) * m


def _pad_cast(x, shape, dtype, fill=0.0):
    """Cast + pad, but only materialize a copy when actually needed."""
    x = x.astype(dtype)
    if tuple(x.shape) == tuple(shape):
        return x
    buf = jnp.full(shape, fill, dtype)
    return lax.dynamic_update_slice(buf, x, (0,) * x.ndim)


def _alif_chunk_kernel(x_ref, w_ref, tau_mem_ref, tau_adp_ref,
                       z0_ref, u0_ref, a0_ref,
                       z_seq_ref, u_out_ref, a_out_ref,
                       alpha_s, nalpha_s, rho_s, nrho_s,
                       in_sum_s, z_s, u_s, a_s,
                       *, seq_len, padded_seq_len, time_chunk):
    c = pl.program_id(1)                 # time-chunk index (inner, "arbitrary")
    tc, tb, inp = x_ref.shape
    lp = w_ref.shape[1]
    f32 = jnp.float32

    @pl.when(c == 0)
    def _init():
        # Decay factors never change across timesteps: compute once per tile.
        alpha = jnp.exp(-1.0 / jnp.abs(tau_mem_ref[...]))
        rho = jnp.exp(-1.0 / jnp.abs(tau_adp_ref[...]))
        alpha_s[...] = alpha
        nalpha_s[...] = 1.0 - alpha
        rho_s[...] = rho
        nrho_s[...] = 1.0 - rho
        # Load the initial recurrent state for this batch tile.
        z_s[...] = z0_ref[...].astype(f32)
        u_s[...] = u0_ref[...].astype(f32)
        a_s[...] = a0_ref[...].astype(f32)

    # ---- Hoisted input projection: one bf16 MXU call for the whole chunk ----
    # tb is aligned to the operand dtype's sublane tile (16 for bf16, 8 for
    # f32), so the (TC, tb, INp) -> (TC*tb, INp) merge is layout-preserving.
    x2 = x_ref[...].reshape(tc * tb, inp)
    in_sum = jnp.dot(x2, w_ref[...], preferred_element_type=f32)   # (TC*tb, Lp)
    in_sum_s[...] = in_sum.reshape(tc, tb, lp)

    alpha = alpha_s[...]
    nalpha = nalpha_s[...]
    rho = rho_s[...]
    nrho = nrho_s[...]
    needs_mask = padded_seq_len != seq_len   # static Python bool

    # ---- Serial ALIF recurrence over the chunk: pure VPU elementwise ----
    def step(i, carry):
        z_prev = z_s[...]
        u_prev = u_s[...]
        a_prev = a_s[...]
        a_new = a_prev * rho + z_prev * nrho
        theta_t = DEFAULT_ALIF_THETA + a_new * DEFAULT_ALIF_BETA
        u_new = u_prev * alpha + in_sum_s[i] * nalpha
        z_new = (u_new - theta_t > 0.0).astype(f32)   # Heaviside forward
        u_new = u_new - z_new * theta_t
        if needs_mask:
            # Padded timesteps past the true sequence must not advance state.
            valid = (c * time_chunk + i) < seq_len
            z_new = jnp.where(valid, z_new, z_prev)
            u_new = jnp.where(valid, u_new, u_prev)
            a_new = jnp.where(valid, a_new, a_prev)
        z_s[...] = z_new
        u_s[...] = u_new
        a_s[...] = a_new
        z_seq_ref[i] = z_new.astype(z_seq_ref.dtype)
        return carry

    lax.fori_loop(0, tc, step, 0, unroll=True)

    # Final membrane / adaptation state: resident output blocks are flushed to
    # HBM once per batch tile, after the last time chunk.
    @pl.when(c == pl.num_programs(1) - 1)
    def _flush():
        u_out_ref[...] = u_s[...]
        a_out_ref[...] = a_s[...]


def _choose_time_chunk(seq_len, tb, inp, lp, x_bytes, z_bytes,
                       budget_bytes=20 << 20, max_rows=256):
    """Largest time chunk whose pipeline working set fits a VMEM budget."""
    per_t = (2 * tb * inp * x_bytes      # x chunk, double-buffered
             + 2 * tb * lp * z_bytes     # z_seq chunk, double-buffered
             + tb * lp * 4)              # in_sum scratch
    fixed = (2 * inp * lp * x_bytes      # resident weight buffers
             + 13 * tb * lp * 4          # state scratch + z0/u0/a0 + u/a out
             + 16 * lp * 4)              # alpha/rho scratch + taus
    tc = (budget_bytes - fixed) // max(per_t, 1)
    cap = max(1, max_rows // tb)         # keep the per-chunk matmul M modest
    return int(max(1, min(tc, cap, seq_len)))


def alif_cell_sequence(x_seq, weight, tau_mem, tau_adp, state, *,
                       batch_tile=None, time_chunk=None,
                       matmul_dtype=jnp.bfloat16, spike_dtype=jnp.bfloat16,
                       vmem_budget_bytes=20 << 20):
    """Run ALIFCell.forward over a whole sequence in one fused Pallas kernel.

    x_seq:   (T, B, input_size)
    weight:  (layer_size, input_size)   -- nn.Linear layout, bias=False
    tau_mem, tau_adp: (layer_size,)
    state:   (z, u, a), each (B, layer_size)
    Returns (z_seq, u_T, a_T). z_seq has dtype `spike_dtype` (spikes are
    exactly 0/1, so bf16 storage is lossless); u_T / a_T are float32.
    """
    z0, u0, a0 = state
    T, B, IN = x_seq.shape
    L = weight.shape[0]
    f32 = jnp.float32
    x_bytes = jnp.dtype(matmul_dtype).itemsize
    z_bytes = jnp.dtype(spike_dtype).itemsize

    # Lane/sublane-dense padding. Batch tile is aligned to the matmul operand
    # sublane tile so the in-kernel (TC, tb, INp)->(TC*tb, INp) merge is free.
    sub = max(8, 32 // x_bytes)          # 8 for f32, 16 for bf16
    INp = _round_up(IN, 128)
    Lp = _round_up(L, 128)
    Bp = _round_up(B, sub)
    if batch_tile is None:
        # Prefer >=2 batch tiles when the batch allows it (v7x megacore).
        tb = Bp if Bp <= 2 * sub else min(_round_up((Bp + 1) // 2, sub), 256)
    else:
        tb = _round_up(min(batch_tile, Bp), sub)
    Bp = _round_up(Bp, tb)
    nb = Bp // tb

    if time_chunk is None:
        TC = _choose_time_chunk(T, tb, INp, Lp, x_bytes, z_bytes,
                                budget_bytes=vmem_budget_bytes)
    else:
        TC = max(1, int(time_chunk))
    T_pad = _round_up(T, TC)
    n_chunks = T_pad // TC

    # Operand prep — copies only when padding / casting is actually required.
    x_p = _pad_cast(x_seq, (T_pad, Bp, INp), matmul_dtype)
    w_t = _pad_cast(weight.T, (INp, Lp), matmul_dtype)      # transposed ONCE
    # Pad taus with 1.0 so exp(-1/|tau|) stays finite in dead lanes; zero
    # weight columns / x rows keep padded u/a/z at 0 for all timesteps.
    tau_mem_p = _pad_cast(tau_mem.reshape(1, L), (1, Lp), f32, fill=1.0)
    tau_adp_p = _pad_cast(tau_adp.reshape(1, L), (1, Lp), f32, fill=1.0)
    z0_p = _pad_cast(z0, (Bp, Lp), f32)
    u0_p = _pad_cast(u0, (Bp, Lp), f32)
    a0_p = _pad_cast(a0, (Bp, Lp), f32)

    kernel = functools.partial(_alif_chunk_kernel, seq_len=T,
                               padded_seq_len=T_pad, time_chunk=TC)

    in_specs = [
        pl.BlockSpec((TC, tb, INp), lambda b, c: (c, b, 0)),  # x chunk
        pl.BlockSpec((INp, Lp), lambda b, c: (0, 0)),         # weight (resident)
        pl.BlockSpec((1, Lp), lambda b, c: (0, 0)),           # tau_mem (resident)
        pl.BlockSpec((1, Lp), lambda b, c: (0, 0)),           # tau_adp (resident)
        pl.BlockSpec((tb, Lp), lambda b, c: (b, 0)),          # z0
        pl.BlockSpec((tb, Lp), lambda b, c: (b, 0)),          # u0
        pl.BlockSpec((tb, Lp), lambda b, c: (b, 0)),          # a0
    ]
    out_specs = [
        pl.BlockSpec((TC, tb, Lp), lambda b, c: (c, b, 0)),   # spikes per step
        pl.BlockSpec((tb, Lp), lambda b, c: (b, 0)),          # final u
        pl.BlockSpec((tb, Lp), lambda b, c: (b, 0)),          # final a
    ]
    out_shape = (
        jax.ShapeDtypeStruct((T_pad, Bp, Lp), spike_dtype),
        jax.ShapeDtypeStruct((Bp, Lp), f32),
        jax.ShapeDtypeStruct((Bp, Lp), f32),
    )
    scratch_shapes = [
        pltpu.VMEM((1, Lp), f32),        # alpha
        pltpu.VMEM((1, Lp), f32),        # 1 - alpha
        pltpu.VMEM((1, Lp), f32),        # rho
        pltpu.VMEM((1, Lp), f32),        # 1 - rho
        pltpu.VMEM((TC, tb, Lp), f32),   # hoisted in_sum for the chunk
        pltpu.VMEM((tb, Lp), f32),       # z state carry
        pltpu.VMEM((tb, Lp), f32),       # u state carry
        pltpu.VMEM((tb, Lp), f32),       # a state carry
    ]

    # VMEM working-set estimate -> explicit scoped limit (capped at v7x 64 MiB).
    vmem_est = (2 * TC * tb * INp * x_bytes + 2 * TC * tb * Lp * z_bytes
                + 2 * INp * Lp * x_bytes + TC * tb * Lp * 4
                + 13 * tb * Lp * 4 + 16 * Lp * 4)
    vmem_limit = int(min(max(2 * vmem_est, 32 << 20), 64 << 20))

    # Default double-buffering on the x chunk is sufficient here (the chunk's
    # compute window is large relative to its DMA); no pl.Buffered override.
    z_seq_p, u_p, a_p = pl.pallas_call(
        kernel,
        grid=(nb, n_chunks),
        in_specs=in_specs,
        out_specs=out_specs,
        out_shape=out_shape,
        scratch_shapes=scratch_shapes,
        input_output_aliases={5: 1, 6: 2},   # u, a updated in place
        compiler_params=pltpu.CompilerParams(
            dimension_semantics=("parallel", "arbitrary"),
            vmem_limit_bytes=vmem_limit),
    )(x_p, w_t, tau_mem_p, tau_adp_p, z0_p, u0_p, a0_p)

    if (T_pad, Bp, Lp) != (T, B, L):
        z_seq_p = z_seq_p[:T, :B, :L]
    if (Bp, Lp) != (B, L):
        u_p = u_p[:B, :L]
        a_p = a_p[:B, :L]
    return z_seq_p, u_p, a_p


def alif_cell_forward(x, weight, tau_mem, tau_adp, state):
    """Single-step ALIFCell.forward (T == 1 specialization of the fused kernel)."""
    z_seq, u, a = alif_cell_sequence(x[None], weight, tau_mem, tau_adp, state,
                                     spike_dtype=jnp.float32)
    return z_seq[0], u, a


# ---------------------------------------------------------------------------
# Reference + test
# ---------------------------------------------------------------------------
def alif_reference(x_seq, weight, tau_mem, tau_adp, state,
                   matmul_dtype=jnp.bfloat16):
    """Plain-JAX ALIFCell.forward applied T times, same matmul operand dtype."""
    z, u, a = state
    alpha = jnp.exp(-1.0 / jnp.abs(tau_mem))
    rho = jnp.exp(-1.0 / jnp.abs(tau_adp))
    w_t = weight.astype(matmul_dtype).T
    zs = []
    for t in range(x_seq.shape[0]):
        in_sum = jnp.dot(x_seq[t].astype(matmul_dtype), w_t,
                         preferred_element_type=jnp.float32)
        a = a * rho + z * (1.0 - rho)
        theta_t = DEFAULT_ALIF_THETA + a * DEFAULT_ALIF_BETA
        u = u * alpha + in_sum * (1.0 - alpha)
        z = (u - theta_t > 0.0).astype(jnp.float32)
        u = u - z * theta_t
        zs.append(z)
    return jnp.stack(zs), u, a


def _check(z_k, u_k, a_k, z_r, u_r, a_r, name):
    z_k = z_k.astype(jnp.float32)
    mism = jnp.abs(z_k - z_r)                       # 0/1 per spike
    frac = float(jnp.mean(mism))
    assert frac < 0.02, f"{name}: spike mismatch fraction {frac}"
    # Tolerant to pathological near-threshold flips from matmul rounding:
    # neurons with exact spike agreement must also match tightly in u / a.
    ok = jnp.sum(mism, axis=0) == 0.0               # (B, L)
    assert float(jnp.mean(ok)) > 0.95, f"{name}: too many diverged neurons"
    du = float(jnp.max(jnp.where(ok, jnp.abs(u_k - u_r), 0.0)))
    da = float(jnp.max(jnp.where(ok, jnp.abs(a_k - a_r), 0.0)))
    assert du < 1e-3 and da < 1e-3, f"{name}: du={du} da={da}"


if __name__ == "__main__":
    # Small shapes consistent with the module: seq=12, batch=4, in=32, layer=32
    T, B, IN, L = 12, 4, 32, 32
    key = jax.random.PRNGKey(0)
    k_x, k_w, k_tm, k_ta, k_u, k_a = jax.random.split(key, 6)

    # Deterministic synthetic parameter init mirroring __init__:
    limit = (6.0 / (IN + L)) ** 0.5                              # xavier-uniform
    weight = jax.random.uniform(k_w, (L, IN), jnp.float32, -limit, limit)
    tau_mem = 20.0 + 5.0 * jax.random.normal(k_tm, (L,), jnp.float32)
    tau_adp = 150.0 + 10.0 * jax.random.normal(k_ta, (L,), jnp.float32)

    x_seq = jax.random.normal(k_x, (T, B, IN), jnp.float32)
    z0 = jnp.zeros((B, L), jnp.float32)
    u0 = 0.1 * jax.random.normal(k_u, (B, L), jnp.float32)
    a0 = 0.1 * jax.random.normal(k_a, (B, L), jnp.float32)
    state = (z0, u0, a0)

    # 1) Default path: auto-sized time chunk (whole sequence fits one chunk).
    out_auto = alif_cell_sequence(x_seq, weight, tau_mem, tau_adp, state)
    jax.block_until_ready(out_auto)

    # 2) Forced small chunk: exercises multi-chunk state carry + padded-tail mask.
    out_chunked = alif_cell_sequence(x_seq, weight, tau_mem, tau_adp, state,
                                     time_chunk=5)
    jax.block_until_ready(out_chunked)

    ref = alif_reference(x_seq, weight, tau_mem, tau_adp, state)
    _check(*out_auto, *ref, name="auto-chunk")
    _check(*out_chunked, *ref, name="chunk=5 (masked tail)")

    print("KERNEL_OK")
</pallas_src>

<mosaic_0001>
module attributes {stable_mosaic.version = 11 : i64} {
  func.func @_alif_chunk_kernel(%arg0: i32, %arg1: i32, %arg2: memref<12x16x128xbf16, #tpu.memory_space<vmem>>, %arg3: memref<128x128xbf16, #tpu.memory_space<vmem>>, %arg4: memref<1x128xf32, #tpu.memory_space<vmem>>, %arg5: memref<1x128xf32, #tpu.memory_space<vmem>>, %arg6: memref<16x128xf32, #tpu.memory_space<vmem>>, %arg7: memref<16x128xf32, #tpu.memory_space<vmem>>, %arg8: memref<16x128xf32, #tpu.memory_space<vmem>>, %arg9: memref<12x16x128xbf16, #tpu.memory_space<vmem>>, %arg10: memref<16x128xf32, #tpu.memory_space<vmem>>, %arg11: memref<16x128xf32, #tpu.memory_space<vmem>>, %arg12: memref<1x128xf32, #tpu.memory_space<vmem>>, %arg13: memref<1x128xf32, #tpu.memory_space<vmem>>, %arg14: memref<1x128xf32, #tpu.memory_space<vmem>>, %arg15: memref<1x128xf32, #tpu.memory_space<vmem>>, %arg16: memref<12x16x128xf32, #tpu.memory_space<vmem>>, %arg17: memref<16x128xf32, #tpu.memory_space<vmem>>, %arg18: memref<16x128xf32, #tpu.memory_space<vmem>>, %arg19: memref<16x128xf32, #tpu.memory_space<vmem>>) attributes {dimension_semantics = [#tpu.dimension_semantics<parallel>, #tpu.dimension_semantics<arbitrary>], iteration_bounds = array<i64: 1, 1>, scalar_prefetch = 0 : i64, scratch_operands = 8 : i64, tpu.core_type = #tpu.core_type<tc>, window_params = [{transform_indices = @transform_0, window_bounds = array<i64: 12, 16, 128>}, {pipeline_mode = #tpu.pipeline_mode<synchronous>, transform_indices = @transform_1, window_bounds = array<i64: 128, 128>}, {pipeline_mode = #tpu.pipeline_mode<synchronous>, transform_indices = @transform_2, window_bounds = array<i64: 1, 128>}, {pipeline_mode = #tpu.pipeline_mode<synchronous>, transform_indices = @transform_3, window_bounds = array<i64: 1, 128>}, {transform_indices = @transform_4, window_bounds = array<i64: 16, 128>}, {transform_indices = @transform_5, window_bounds = array<i64: 16, 128>}, {transform_indices = @transform_6, window_bounds = array<i64: 16, 128>}, {transform_indices = @transform_7, window_bounds = array<i64: 12, 16, 128>}, {transform_indices = @transform_8, window_bounds = array<i64: 16, 128>}, {transform_indices = @transform_9, window_bounds = array<i64: 16, 128>}]} {
    %c0_i32 = arith.constant 0 : i32
    %0 = arith.cmpi eq, %arg1, %c0_i32 : i32
    %1 = arith.extui %0 : i1 to i32
    %c0_i32_0 = arith.constant 0 : i32
    %2 = arith.cmpi ne, %1, %c0_i32_0 : i32
    scf.if %2 {
      %c0_247 = arith.constant 0 : index
      %c0_248 = arith.constant 0 : index
      %436 = vector.load %arg4[%c0_247, %c0_248] : memref<1x128xf32, #tpu.memory_space<vmem>>, vector<1x128xf32>
      %437 = math.absf %436 : vector<1x128xf32>
      %cst_249 = arith.constant -1.000000e+00 : f32
      %438 = vector.broadcast %cst_249 : f32 to vector<1x128xf32>
      %439 = arith.divf %438, %437 : vector<1x128xf32>
      %440 = math.exp %439 : vector<1x128xf32>
      %c0_250 = arith.constant 0 : index
      %c0_251 = arith.constant 0 : index
      %441 = vector.load %arg5[%c0_250, %c0_251] : memref<1x128xf32, #tpu.memory_space<vmem>>, vector<1x128xf32>
      %442 = math.absf %441 : vector<1x128xf32>
      %cst_252 = arith.constant -1.000000e+00 : f32
      %443 = vector.broadcast %cst_252 : f32 to vector<1x128xf32>
      %444 = arith.divf %443, %442 : vector<1x128xf32>
      %445 = math.exp %444 : vector<1x128xf32>
      %c0_253 = arith.constant 0 : index
      %c0_254 = arith.constant 0 : index
      %446 = vector.load %arg12[%c0_253, %c0_254] : memref<1x128xf32, #tpu.memory_space<vmem>>, vector<1x128xf32>
      tpu.vector_store %arg12[%c0_253, %c0_254], %440 {strides = array<i32>} : memref<1x128xf32, #tpu.memory_space<vmem>>, vector<1x128xf32>,
      %cst_255 = arith.constant 1.000000e+00 : f32
      %447 = vector.broadcast %cst_255 : f32 to vector<1x128xf32>
      %448 = arith.subf %447, %440 : vector<1x128xf32>
      %c0_256 = arith.constant 0 : index
      %c0_257 = arith.constant 0 : index
      %449 = vector.load %arg13[%c0_256, %c0_257] : memref<1x128xf32, #tpu.memory_space<vmem>>, vector<1x128xf32>
      tpu.vector_store %arg13[%c0_256, %c0_257], %448 {strides = array<i32>} : memref<1x128xf32, #tpu.memory_space<vmem>>, vector<1x128xf32>,
      %c0_258 = arith.constant 0 : index
      %c0_259 = arith.constant 0 : index
      %450 = vector.load %arg14[%c0_258, %c0_259] : memref<1x128xf32, #tpu.memory_space<vmem>>, vector<1x128xf32>
      tpu.vector_store %arg14[%c0_258, %c0_259], %445 {strides = array<i32>} : memref<1x128xf32, #tpu.memory_space<vmem>>, vector<1x128xf32>,
      %cst_260 = arith.constant 1.000000e+00 : f32
      %451 = vector.broadcast %cst_260 : f32 to vector<1x128xf32>
      %452 = arith.subf %451, %445 : vector<1x128xf32>
      %c0_261 = arith.constant 0 : index
      %c0_262 = arith.constant 0 : index
      %453 = vector.load %arg15[%c0_261, %c0_262] : memref<1x128xf32, #tpu.memory_space<vmem>>, vector<1x128xf32>
      tpu.vector_store %arg15[%c0_261, %c0_262], %452 {strides = array<i32>} : memref<1x128xf32, #tpu.memory_space<vmem>>, vector<1x128xf32>,
      %c0_263 = arith.constant 0 : index
      %c0_264 = arith.constant 0 : index
      %454 = vector.load %arg6[%c0_263, %c0_264] : memref<16x128xf32, #tpu.memory_space<vmem>>, vector<16x128xf32>
      %c0_265 = arith.constant 0 : index
      %c0_266 = arith.constant 0 : index
      %455 = vector.load %arg17[%c0_265, %c0_266] : memref<16x128xf32, #tpu.memory_space<vmem>>, vector<16x128xf32>
      tpu.vector_store %arg17[%c0_265, %c0_266], %454 {strides = array<i32>} : memref<16x128xf32, #tpu.memory_space<vmem>>, vector<16x128xf32>,
      %c0_267 = arith.constant 0 : index
      %c0_268 = arith.constant 0 : index
      %456 = vector.load %arg7[%c0_267, %c0_268] : memref<16x128xf32, #tpu.memory_space<vmem>>, vector<16x128xf32>
      %c0_269 = arith.constant 0 : index
      %c0_270 = arith.constant 0 : index
      %457 = vector.load %arg18[%c0_269, %c0_270] : memref<16x128xf32, #tpu.memory_space<vmem>>, vector<16x128xf32>
      tpu.vector_store %arg18[%c0_269, %c0_270], %456 {strides = array<i32>} : memref<16x128xf32, #tpu.memory_space<vmem>>, vector<16x128xf32>,
      %c0_271 = arith.constant 0 : index
      %c0_272 = arith.constant 0 : index
      %458 = vector.load %arg8[%c0_271, %c0_272] : memref<16x128xf32, #tpu.memory_space<vmem>>, vector<16x128xf32>
      %c0_273 = arith.constant 0 : index
      %c0_274 = arith.constant 0 : index
      %459 = vector.load %arg19[%c0_273, %c0_274] : memref<16x128xf32, #tpu.memory_space<vmem>>, vector<16x128xf32>
      tpu.vector_store %arg19[%c0_273, %c0_274], %458 {strides = array<i32>} : memref<16x128xf32, #tpu.memory_space<vmem>>, vector<16x128xf32>,
    } else {
    }
    %c0 = arith.constant 0 : index
    %c0_1 = arith.constant 0 : index
    %c0_2 = arith.constant 0 : index
    %3 = vector.load %arg2[%c0, %c0_1, %c0_2] : memref<12x16x128xbf16, #tpu.memory_space<vmem>>, vector<12x16x128xbf16>
    %4 = vector.shape_cast %3 : vector<12x16x128xbf16> to vector<192x128xbf16>
    %c0_3 = arith.constant 0 : index
    %c0_4 = arith.constant 0 : index
    %5 = vector.load %arg3[%c0_3, %c0_4] : memref<128x128xbf16, #tpu.memory_space<vmem>>, vector<128x128xbf16>
    %cst = arith.constant dense<0.000000e+00> : vector<192x128xf32>
    %6 = tpu.matmul %4, %5, %cst {dimension_numbers = #tpu.dot_dimension_numbers<[1], [0], [0], [1], [0, 0, 1, 1], [], []>} : vector<192x128xbf16>, vector<128x128xbf16>, vector<192x128xf32> -> vector<192x128xf32>
    %7 = vector.shape_cast %6 : vector<192x128xf32> to vector<12x16x128xf32>
    %c0_5 = arith.constant 0 : index
    %c0_6 = arith.constant 0 : index
    %c0_7 = arith.constant 0 : index
    %8 = vector.load %arg16[%c0_5, %c0_6, %c0_7] : memref<12x16x128xf32, #tpu.memory_space<vmem>>, vector<12x16x128xf32>
    tpu.vector_store %arg16[%c0_5, %c0_6, %c0_7], %7 {strides = array<i32>} : memref<12x16x128xf32, #tpu.memory_space<vmem>>, vector<12x16x128xf32>,
    %c0_8 = arith.constant 0 : index
    %c0_9 = arith.constant 0 : index
    %9 = vector.load %arg12[%c0_8, %c0_9] : memref<1x128xf32, #tpu.memory_space<vmem>>, vector<1x128xf32>
    %c0_10 = arith.constant 0 : index
    %c0_11 = arith.constant 0 : index
    %10 = vector.load %arg13[%c0_10, %c0_11] : memref<1x128xf32, #tpu.memory_space<vmem>>, vector<1x128xf32>
    %c0_12 = arith.constant 0 : index
    %c0_13 = arith.constant 0 : index
    %11 = vector.load %arg14[%c0_12, %c0_13] : memref<1x128xf32, #tpu.memory_space<vmem>>, vector<1x128xf32>
    %c0_14 = arith.constant 0 : index
    %c0_15 = arith.constant 0 : index
    %12 = vector.load %arg15[%c0_14, %c0_15] : memref<1x128xf32, #tpu.memory_space<vmem>>, vector<1x128xf32>
    %c0_i32_16 = arith.constant 0 : i32
    %c0_17 = arith.constant 0 : index
    %c0_18 = arith.constant 0 : index
    %13 = vector.load %arg17[%c0_17, %c0_18] : memref<16x128xf32, #tpu.memory_space<vmem>>, vector<16x128xf32>
    %c0_19 = arith.constant 0 : index
    %c0_20 = arith.constant 0 : index
    %14 = vector.load %arg18[%c0_19, %c0_20] : memref<16x128xf32, #tpu.memory_space<vmem>>, vector<16x128xf32>
    %c0_21 = arith.constant 0 : index
    %c0_22 = arith.constant 0 : index
    %15 = vector.load %arg19[%c0_21, %c0_22] : memref<16x128xf32, #tpu.memory_space<vmem>>, vector<16x128xf32>
    %16 = vector.broadcast %11 : vector<1x128xf32> to vector<16x128xf32>
    %17 = arith.mulf %15, %16 : vector<16x128xf32>
    %18 = vector.broadcast %12 : vector<1x128xf32> to vector<16x128xf32>
    %19 = arith.mulf %13, %18 : vector<16x128xf32>
    %20 = arith.addf %17, %19 : vector<16x128xf32>
    %cst_23 = arith.constant 1.800000e+00 : f32
    %21 = vector.broadcast %cst_23 : f32 to vector<16x128xf32>
    %22 = arith.mulf %20, %21 : vector<16x128xf32>
    %cst_24 = arith.constant 0.00999999977 : f32
    %23 = vector.broadcast %cst_24 : f32 to vector<16x128xf32>
    %24 = arith.addf %23, %22 : vector<16x128xf32>
    %25 = vector.broadcast %9 : vector<1x128xf32> to vector<16x128xf32>
    %26 = arith.mulf %14, %25 : vector<16x128xf32>
    %27 = arith.index_cast %c0_i32_16 : i32 to index
    %c0_25 = arith.constant 0 : index
    %c0_26 = arith.constant 0 : index
    %28 = vector.load %arg16[%27, %c0_25, %c0_26] : memref<12x16x128xf32, #tpu.memory_space<vmem>>, vector<1x16x128xf32>
    %29 = vector.shape_cast %28 : vector<1x16x128xf32> to vector<16x128xf32>
    %30 = vector.broadcast %10 : vector<1x128xf32> to vector<16x128xf32>
    %31 = arith.mulf %29, %30 : vector<16x128xf32>
    %32 = arith.addf %26, %31 : vector<16x128xf32>
    %33 = arith.subf %32, %24 : vector<16x128xf32>
    %cst_27 = arith.constant 0.000000e+00 : f32
    %34 = vector.broadcast %cst_27 : f32 to vector<16x128xf32>
    %35 = arith.cmpf ogt, %33, %34 : vector<16x128xf32>
    %36 = arith.extui %35 : vector<16x128xi1> to vector<16x128xi32>
    %37 = arith.sitofp %36 : vector<16x128xi32> to vector<16x128xf32>
    %38 = arith.mulf %37, %24 : vector<16x128xf32>
    %39 = arith.subf %32, %38 : vector<16x128xf32>
    %c0_28 = arith.constant 0 : index
    %c0_29 = arith.constant 0 : index
    %40 = vector.load %arg17[%c0_28, %c0_29] : memref<16x128xf32, #tpu.memory_space<vmem>>, vector<16x128xf32>
    tpu.vector_store %arg17[%c0_28, %c0_29], %37 {strides = array<i32>} : memref<16x128xf32, #tpu.memory_space<vmem>>, vector<16x128xf32>,
    %c0_30 = arith.constant 0 : index
    %c0_31 = arith.constant 0 : index
    %41 = vector.load %arg18[%c0_30, %c0_31] : memref<16x128xf32, #tpu.memory_space<vmem>>, vector<16x128xf32>
    tpu.vector_store %arg18[%c0_30, %c0_31], %39 {strides = array<i32>} : memref<16x128xf32, #tpu.memory_space<vmem>>, vector<16x128xf32>,
    %c0_32 = arith.constant 0 : index
    %c0_33 = arith.constant 0 : index
    %42 = vector.load %arg19[%c0_32, %c0_33] : memref<16x128xf32, #tpu.memory_space<vmem>>, vector<16x128xf32>
    tpu.vector_store %arg19[%c0_32, %c0_33], %20 {strides = array<i32>} : memref<16x128xf32, #tpu.memory_space<vmem>>, vector<16x128xf32>,
    %43 = arith.truncf %37 : vector<16x128xf32> to vector<16x128xbf16>
    %44 = arith.index_cast %c0_i32_16 : i32 to index
    %c0_34 = arith.constant 0 : index
    %c0_35 = arith.constant 0 : index
    %45 = vector.load %arg9[%44, %c0_34, %c0_35] : memref<12x16x128xbf16, #tpu.memory_space<vmem>>, vector<1x16x128xbf16>
    %46 = vector.shape_cast %45 : vector<1x16x128xbf16> to vector<16x128xbf16>
    %47 = vector.shape_cast %43 : vector<16x128xbf16> to vector<1x16x128xbf16>
    tpu.vector_store %arg9[%44, %c0_34, %c0_35], %47 {strides = array<i32>} : memref<12x16x128xbf16, #tpu.memory_space<vmem>>, vector<1x16x128xbf16>,
    %c1_i32 = arith.constant 1 : i32
    %c0_36 = arith.constant 0 : index
    %c0_37 = arith.constant 0 : index
    %48 = vector.load %arg17[%c0_36, %c0_37] : memref<16x128xf32, #tpu.memory_space<vmem>>, vector<16x128xf32>
    %c0_38 = arith.constant 0 : index
    %c0_39 = arith.constant 0 : index
    %49 = vector.load %arg18[%c0_38, %c0_39] : memref<16x128xf32, #tpu.memory_space<vmem>>, vector<16x128xf32>
    %c0_40 = arith.constant 0 : index
    %c0_41 = arith.constant 0 : index
    %50 = vector.load %arg19[%c0_40, %c0_41] : memref<16x128xf32, #tpu.memory_space<vmem>>, vector<16x128xf32>
    %51 = vector.broadcast %11 : vector<1x128xf32> to vector<16x128xf32>
    %52 = arith.mulf %50, %51 : vector<16x128xf32>
    %53 = vector.broadcast %12 : vector<1x128xf32> to vector<16x128xf32>
    %54 = arith.mulf %48, %53 : vector<16x128xf32>
    %55 = arith.addf %52, %54 : vector<16x128xf32>
    %cst_42 = arith.constant 1.800000e+00 : f32
    %56 = vector.broadcast %cst_42 : f32 to vector<16x128xf32>
    %57 = arith.mulf %55, %56 : vector<16x128xf32>
    %cst_43 = arith.constant 0.00999999977 : f32
    %58 = vector.broadcast %cst_43 : f32 to vector<16x128xf32>
    %59 = arith.addf %58, %57 : vector<16x128xf32>
    %60 = vector.broadcast %9 : vector<1x128xf32> to vector<16x128xf32>
    %61 = arith.mulf %49, %60 : vector<16x128xf32>
    %62 = arith.index_cast %c1_i32 : i32 to index
    %c0_44 = arith.constant 0 : index
    %c0_45 = arith.constant 0 : index
    %63 = vector.load %arg16[%62, %c0_44, %c0_45] : memref<12x16x128xf32, #tpu.memory_space<vmem>>, vector<1x16x128xf32>
    %64 = vector.shape_cast %63 : vector<1x16x128xf32> to vector<16x128xf32>
    %65 = vector.broadcast %10 : vector<1x128xf32> to vector<16x128xf32>
    %66 = arith.mulf %64, %65 : vector<16x128xf32>
    %67 = arith.addf %61, %66 : vector<16x128xf32>
    %68 = arith.subf %67, %59 : vector<16x128xf32>
    %cst_46 = arith.constant 0.000000e+00 : f32
    %69 = vector.broadcast %cst_46 : f32 to vector<16x128xf32>
    %70 = arith.cmpf ogt, %68, %69 : vector<16x128xf32>
    %71 = arith.extui %70 : vector<16x128xi1> to vector<16x128xi32>
    %72 = arith.sitofp %71 : vector<16x128xi32> to vector<16x128xf32>
    %73 = arith.mulf %72, %59 : vector<16x128xf32>
    %74 = arith.subf %67, %73 : vector<16x128xf32>
    %c0_47 = arith.constant 0 : index
    %c0_48 = arith.constant 0 : index
    %75 = vector.load %arg17[%c0_47, %c0_48] : memref<16x128xf32, #tpu.memory_space<vmem>>, vector<16x128xf32>
    tpu.vector_store %arg17[%c0_47, %c0_48], %72 {strides = array<i32>} : memref<16x128xf32, #tpu.memory_space<vmem>>, vector<16x128xf32>,
    %c0_49 = arith.constant 0 : index
    %c0_50 = arith.constant 0 : index
    %76 = vector.load %arg18[%c0_49, %c0_50] : memref<16x128xf32, #tpu.memory_space<vmem>>, vector<16x128xf32>
    tpu.vector_store %arg18[%c0_49, %c0_50], %74 {strides = array<i32>} : memref<16x128xf32, #tpu.memory_space<vmem>>, vector<16x128xf32>,
    %c0_51 = arith.constant 0 : index
    %c0_52 = arith.constant 0 : index
    %77 = vector.load %arg19[%c0_51, %c0_52] : memref<16x128xf32, #tpu.memory_space<vmem>>, vector<16x128xf32>
    tpu.vector_store %arg19[%c0_51, %c0_52], %55 {strides = array<i32>} : memref<16x128xf32, #tpu.memory_space<vmem>>, vector<16x128xf32>,
    %78 = arith.truncf %72 : vector<16x128xf32> to vector<16x128xbf16>
    %79 = arith.index_cast %c1_i32 : i32 to index
    %c0_53 = arith.constant 0 : index
    %c0_54 = arith.constant 0 : index
    %80 = vector.load %arg9[%79, %c0_53, %c0_54] : memref<12x16x128xbf16, #tpu.memory_space<vmem>>, vector<1x16x128xbf16>
    %81 = vector.shape_cast %80 : vector<1x16x128xbf16> to vector<16x128xbf16>
    %82 = vector.shape_cast %78 : vector<16x128xbf16> to vector<1x16x128xbf16>
    tpu.vector_store %arg9[%79, %c0_53, %c0_54], %82 {strides = array<i32>} : memref<12x16x128xbf16, #tpu.memory_space<vmem>>, vector<1x16x128xbf16>,
    %c2_i32 = arith.constant 2 : i32
    %c0_55 = arith.constant 0 : index
    %c0_56 = arith.constant 0 : index
    %83 = vector.load %arg17[%c0_55, %c0_56] : memref<16x128xf32, #tpu.memory_space<vmem>>, vector<16x128xf32>
    %c0_57 = arith.constant 0 : index
    %c0_58 = arith.constant 0 : index
    %84 = vector.load %arg18[%c0_57, %c0_58] : memref<16x128xf32, #tpu.memory_space<vmem>>, vector<16x128xf32>
    %c0_59 = arith.constant 0 : index
    %c0_60 = arith.constant 0 : index
    %85 = vector.load %arg19[%c0_59, %c0_60] : memref<16x128xf32, #tpu.memory_space<vmem>>, vector<16x128xf32>
    %86 = vector.broadcast %11 : vector<1x128xf32> to vector<16x128xf32>
    %87 = arith.mulf %85, %86 : vector<16x128xf32>
    %88 = vector.broadcast %12 : vector<1x128xf32> to vector<16x128xf32>
    %89 = arith.mulf %83, %88 : vector<16x128xf32>
    %90 = arith.addf %87, %89 : vector<16x128xf32>
    %cst_61 = arith.constant 1.800000e+00 : f32
    %91 = vector.broadcast %cst_61 : f32 to vector<16x128xf32>
    %92 = arith.mulf %90, %91 : vector<16x128xf32>
    %cst_62 = arith.constant 0.00999999977 : f32
    %93 = vector.broadcast %cst_62 : f32 to vector<16x128xf32>
    %94 = arith.addf %93, %92 : vector<16x128xf32>
    %95 = vector.broadcast %9 : vector<1x128xf32> to vector<16x128xf32>
    %96 = arith.mulf %84, %95 : vector<16x128xf32>
    %97 = arith.index_cast %c2_i32 : i32 to index
    %c0_63 = arith.constant 0 : index
    %c0_64 = arith.constant 0 : index
    %98 = vector.load %arg16[%97, %c0_63, %c0_64] : memref<12x16x128xf32, #tpu.memory_space<vmem>>, vector<1x16x128xf32>
    %99 = vector.shape_cast %98 : vector<1x16x128xf32> to vector<16x128xf32>
    %100 = vector.broadcast %10 : vector<1x128xf32> to vector<16x128xf32>
    %101 = arith.mulf %99, %100 : vector<16x128xf32>
    %102 = arith.addf %96, %101 : vector<16x128xf32>
    %103 = arith.subf %102, %94 : vector<16x128xf32>
    %cst_65 = arith.constant 0.000000e+00 : f32
    %104 = vector.broadcast %cst_65 : f32 to vector<16x128xf32>
    %105 = arith.cmpf ogt, %103, %104 : vector<16x128xf32>
    %106 = arith.extui %105 : vector<16x128xi1> to vector<16x128xi32>
    %107 = arith.sitofp %106 : vector<16x128xi32> to vector<16x128xf32>
    %108 = arith.mulf %107, %94 : vector<16x128xf32>
    %109 = arith.subf %102, %108 : vector<16x128xf32>
    %c0_66 = arith.constant 0 : index
    %c0_67 = arith.constant 0 : index
    %110 = vector.load %arg17[%c0_66, %c0_67] : memref<16x128xf32, #tpu.memory_space<vmem>>, vector<16x128xf32>
    tpu.vector_store %arg17[%c0_66, %c0_67], %107 {strides = array<i32>} : memref<16x128xf32, #tpu.memory_space<vmem>>, vector<16x128xf32>,
    %c0_68 = arith.constant 0 : index
    %c0_69 = arith.constant 0 : index
    %111 = vector.load %arg18[%c0_68, %c0_69] : memref<16x128xf32, #tpu.memory_space<vmem>>, vector<16x128xf32>
    tpu.vector_store %arg18[%c0_68, %c0_69], %109 {strides = array<i32>} : memref<16x128xf32, #tpu.memory_space<vmem>>, vector<16x128xf32>,
    %c0_70 = arith.constant 0 : index
    %c0_71 = arith.constant 0 : index
    %112 = vector.load %arg19[%c0_70, %c0_71] : memref<16x128xf32, #tpu.memory_space<vmem>>, vector<16x128xf32>
    tpu.vector_store %arg19[%c0_70, %c0_71], %90 {strides = array<i32>} : memref<16x128xf32, #tpu.memory_space<vmem>>, vector<16x128xf32>,
    %113 = arith.truncf %107 : vector<16x128xf32> to vector<16x128xbf16>
    %114 = arith.index_cast %c2_i32 : i32 to index
    %c0_72 = arith.constant 0 : index
    %c0_73 = arith.constant 0 : index
    %115 = vector.load %arg9[%114, %c0_72, %c0_73] : memref<12x16x128xbf16, #tpu.memory_space<vmem>>, vector<1x16x128xbf16>
    %116 = vector.shape_cast %115 : vector<1x16x128xbf16> to vector<16x128xbf16>
    %117 = vector.shape_cast %113 : vector<16x128xbf16> to vector<1x16x128xbf16>
    tpu.vector_store %arg9[%114, %c0_72, %c0_73], %117 {strides = array<i32>} : memref<12x16x128xbf16, #tpu.memory_space<vmem>>, vector<1x16x128xbf16>,
    %c3_i32 = arith.constant 3 : i32
    %c0_74 = arith.constant 0 : index
    %c0_75 = arith.constant 0 : index
    %118 = vector.load %arg17[%c0_74, %c0_75] : memref<16x128xf32, #tpu.memory_space<vmem>>, vector<16x128xf32>
    %c0_76 = arith.constant 0 : index
    %c0_77 = arith.constant 0 : index
    %119 = vector.load %arg18[%c0_76, %c0_77] : memref<16x128xf32, #tpu.memory_space<vmem>>, vector<16x128xf32>
    %c0_78 = arith.constant 0 : index
    %c0_79 = arith.constant 0 : index
    %120 = vector.load %arg19[%c0_78, %c0_79] : memref<16x128xf32, #tpu.memory_space<vmem>>, vector<16x128xf32>
    %121 = vector.broadcast %11 : vector<1x128xf32> to vector<16x128xf32>
    %122 = arith.mulf %120, %121 : vector<16x128xf32>
    %123 = vector.broadcast %12 : vector<1x128xf32> to vector<16x128xf32>
    %124 = arith.mulf %118, %123 : vector<16x128xf32>
    %125 = arith.addf %122, %124 : vector<16x128xf32>
    %cst_80 = arith.constant 1.800000e+00 : f32
    %126 = vector.broadcast %cst_80 : f32 to vector<16x128xf32>
    %127 = arith.mulf %125, %126 : vector<16x128xf32>
    %cst_81 = arith.constant 0.00999999977 : f32
    %128 = vector.broadcast %cst_81 : f32 to vector<16x128xf32>
    %129 = arith.addf %128, %127 : vector<16x128xf32>
    %130 = vector.broadcast %9 : vector<1x128xf32> to vector<16x128xf32>
    %131 = arith.mulf %119, %130 : vector<16x128xf32>
    %132 = arith.index_cast %c3_i32 : i32 to index
    %c0_82 = arith.constant 0 : index
    %c0_83 = arith.constant 0 : index
    %133 = vector.load %arg16[%132, %c0_82, %c0_83] : memref<12x16x128xf32, #tpu.memory_space<vmem>>, vector<1x16x128xf32>
    %134 = vector.shape_cast %133 : vector<1x16x128xf32> to vector<16x128xf32>
    %135 = vector.broadcast %10 : vector<1x128xf32> to vector<16x128xf32>
    %136 = arith.mulf %134, %135 : vector<16x128xf32>
    %137 = arith.addf %131, %136 : vector<16x128xf32>
    %138 = arith.subf %137, %129 : vector<16x128xf32>
    %cst_84 = arith.constant 0.000000e+00 : f32
    %139 = vector.broadcast %cst_84 : f32 to vector<16x128xf32>
    %140 = arith.cmpf ogt, %138, %139 : vector<16x128xf32>
    %141 = arith.extui %140 : vector<16x128xi1> to vector<16x128xi32>
    %142 = arith.sitofp %141 : vector<16x128xi32> to vector<16x128xf32>
    %143 = arith.mulf %142, %129 : vector<16x128xf32>
    %144 = arith.subf %137, %143 : vector<16x128xf32>
    %c0_85 = arith.constant 0 : index
    %c0_86 = arith.constant 0 : index
    %145 = vector.load %arg17[%c0_85, %c0_86] : memref<16x128xf32, #tpu.memory_space<vmem>>, vector<16x128xf32>
    tpu.vector_store %arg17[%c0_85, %c0_86], %142 {strides = array<i32>} : memref<16x128xf32, #tpu.memory_space<vmem>>, vector<16x128xf32>,
    %c0_87 = arith.constant 0 : index
    %c0_88 = arith.constant 0 : index
    %146 = vector.load %arg18[%c0_87, %c0_88] : memref<16x128xf32, #tpu.memory_space<vmem>>, vector<16x128xf32>
    tpu.vector_store %arg18[%c0_87, %c0_88], %144 {strides = array<i32>} : memref<16x128xf32, #tpu.memory_space<vmem>>, vector<16x128xf32>,
    %c0_89 = arith.constant 0 : index
    %c0_90 = arith.constant 0 : index
    %147 = vector.load %arg19[%c0_89, %c0_90] : memref<16x128xf32, #tpu.memory_space<vmem>>, vector<16x128xf32>
    tpu.vector_store %arg19[%c0_89, %c0_90], %125 {strides = array<i32>} : memref<16x128xf32, #tpu.memory_space<vmem>>, vector<16x128xf32>,
    %148 = arith.truncf %142 : vector<16x128xf32> to vector<16x128xbf16>
    %149 = arith.index_cast %c3_i32 : i32 to index
    %c0_91 = arith.constant 0 : index
    %c0_92 = arith.constant 0 : index
    %150 = vector.load %arg9[%149, %c0_91, %c0_92] : memref<12x16x128xbf16, #tpu.memory_space<vmem>>, vector<1x16x128xbf16>
    %151 = vector.shape_cast %150 : vector<1x16x128xbf16> to vector<16x128xbf16>
    %152 = vector.shape_cast %148 : vector<16x128xbf16> to vector<1x16x128xbf16>
    tpu.vector_store %arg9[%149, %c0_91, %c0_92], %152 {strides = array<i32>} : memref<12x16x128xbf16, #tpu.memory_space<vmem>>, vector<1x16x128xbf16>,
    %c4_i32 = arith.constant 4 : i32
    %c0_93 = arith.constant 0 : index
    %c0_94 = arith.constant 0 : index
    %153 = vector.load %arg17[%c0_93, %c0_94] : memref<16x128xf32, #tpu.memory_space<vmem>>, vector<16x128xf32>
    %c0_95 = arith.constant 0 : index
    %c0_96 = arith.constant 0 : index
    %154 = vector.load %arg18[%c0_95, %c0_96] : memref<16x128xf32, #tpu.memory_space<vmem>>, vector<16x128xf32>
    %c0_97 = arith.constant 0 : index
    %c0_98 = arith.constant 0 : index
    %155 = vector.load %arg19[%c0_97, %c0_98] : memref<16x128xf32, #tpu.memory_space<vmem>>, vector<16x128xf32>
    %156 = vector.broadcast %11 : vector<1x128xf32> to vector<16x128xf32>
    %157 = arith.mulf %155, %156 : vector<16x128xf32>
    %158 = vector.broadcast %12 : vector<1x128xf32> to vector<16x128xf32>
    %159 = arith.mulf %153, %158 : vector<16x128xf32>
    %160 = arith.addf %157, %159 : vector<16x128xf32>
    %cst_99 = arith.constant 1.800000e+00 : f32
    %161 = vector.broadcast %cst_99 : f32 to vector<16x128xf32>
    %162 = arith.mulf %160, %161 : vector<16x128xf32>
    %cst_100 = arith.constant 0.00999999977 : f32
    %163 = vector.broadcast %cst_100 : f32 to vector<16x128xf32>
    %164 = arith.addf %163, %162 : vector<16x128xf32>
    %165 = vector.broadcast %9 : vector<1x128xf32> to vector<16x128xf32>
    %166 = arith.mulf %154, %165 : vector<16x128xf32>
    %167 = arith.index_cast %c4_i32 : i32 to index
    %c0_101 = arith.constant 0 : index
    %c0_102 = arith.constant 0 : index
    %168 = vector.load %arg16[%167, %c0_101, %c0_102] : memref<12x16x128xf32, #tpu.memory_space<vmem>>, vector<1x16x128xf32>
    %169 = vector.shape_cast %168 : vector<1x16x128xf32> to vector<16x128xf32>
    %170 = vector.broadcast %10 : vector<1x128xf32> to vector<16x128xf32>
    %171 = arith.mulf %169, %170 : vector<16x128xf32>
    %172 = arith.addf %166, %171 : vector<16x128xf32>
    %173 = arith.subf %172, %164 : vector<16x128xf32>
    %cst_103 = arith.constant 0.000000e+00 : f32
    %174 = vector.broadcast %cst_103 : f32 to vector<16x128xf32>
    %175 = arith.cmpf ogt, %173, %174 : vector<16x128xf32>
    %176 = arith.extui %175 : vector<16x128xi1> to vector<16x128xi32>
    %177 = arith.sitofp %176 : vector<16x128xi32> to vector<16x128xf32>
    %178 = arith.mulf %177, %164 : vector<16x128xf32>
    %179 = arith.subf %172, %178 : vector<16x128xf32>
    %c0_104 = arith.constant 0 : index
    %c0_105 = arith.constant 0 : index
    %180 = vector.load %arg17[%c0_104, %c0_105] : memref<16x128xf32, #tpu.memory_space<vmem>>, vector<16x128xf32>
    tpu.vector_store %arg17[%c0_104, %c0_105], %177 {strides = array<i32>} : memref<16x128xf32, #tpu.memory_space<vmem>>, vector<16x128xf32>,
    %c0_106 = arith.constant 0 : index
    %c0_107 = arith.constant 0 : index
    %181 = vector.load %arg18[%c0_106, %c0_107] : memref<16x128xf32, #tpu.memory_space<vmem>>, vector<16x128xf32>
    tpu.vector_store %arg18[%c0_106, %c0_107], %179 {strides = array<i32>} : memref<16x128xf32, #tpu.memory_space<vmem>>, vector<16x128xf32>,
    %c0_108 = arith.constant 0 : index
    %c0_109 = arith.constant 0 : index
    %182 = vector.load %arg19[%c0_108, %c0_109] : memref<16x128xf32, #tpu.memory_space<vmem>>, vector<16x128xf32>
    tpu.vector_store %arg19[%c0_108, %c0_109], %160 {strides = array<i32>} : memref<16x128xf32, #tpu.memory_space<vmem>>, vector<16x128xf32>,
    %183 = arith.truncf %177 : vector<16x128xf32> to vector<16x128xbf16>
    %184 = arith.index_cast %c4_i32 : i32 to index
    %c0_110 = arith.constant 0 : index
    %c0_111 = arith.constant 0 : index
    %185 = vector.load %arg9[%184, %c0_110, %c0_111] : memref<12x16x128xbf16, #tpu.memory_space<vmem>>, vector<1x16x128xbf16>
    %186 = vector.shape_cast %185 : vector<1x16x128xbf16> to vector<16x128xbf16>
    %187 = vector.shape_cast %183 : vector<16x128xbf16> to vector<1x16x128xbf16>
    tpu.vector_store %arg9[%184, %c0_110, %c0_111], %187 {strides = array<i32>} : memref<12x16x128xbf16, #tpu.memory_space<vmem>>, vector<1x16x128xbf16>,
    %c5_i32 = arith.constant 5 : i32
    %c0_112 = arith.constant 0 : index
    %c0_113 = arith.constant 0 : index
    %188 = vector.load %arg17[%c0_112, %c0_113] : memref<16x128xf32, #tpu.memory_space<vmem>>, vector<16x128xf32>
    %c0_114 = arith.constant 0 : index
    %c0_115 = arith.constant 0 : index
    %189 = vector.load %arg18[%c0_114, %c0_115] : memref<16x128xf32, #tpu.memory_space<vmem>>, vector<16x128xf32>
    %c0_116 = arith.constant 0 : index
    %c0_117 = arith.constant 0 : index
    %190 = vector.load %arg19[%c0_116, %c0_117] : memref<16x128xf32, #tpu.memory_space<vmem>>, vector<16x128xf32>
    %191 = vector.broadcast %11 : vector<1x128xf32> to vector<16x128xf32>
    %192 = arith.mulf %190, %191 : vector<16x128xf32>
    %193 = vector.broadcast %12 : vector<1x128xf32> to vector<16x128xf32>
    %194 = arith.mulf %188, %193 : vector<16x128xf32>
    %195 = arith.addf %192, %194 : vector<16x128xf32>
    %cst_118 = arith.constant 1.800000e+00 : f32
    %196 = vector.broadcast %cst_118 : f32 to vector<16x128xf32>
    %197 = arith.mulf %195, %196 : vector<16x128xf32>
    %cst_119 = arith.constant 0.00999999977 : f32
    %198 = vector.broadcast %cst_119 : f32 to vector<16x128xf32>
    %199 = arith.addf %198, %197 : vector<16x128xf32>
    %200 = vector.broadcast %9 : vector<1x128xf32> to vector<16x128xf32>
    %201 = arith.mulf %189, %200 : vector<16x128xf32>
    %202 = arith.index_cast %c5_i32 : i32 to index
    %c0_120 = arith.constant 0 : index
    %c0_121 = arith.constant 0 : index
    %203 = vector.load %arg16[%202, %c0_120, %c0_121] : memref<12x16x128xf32, #tpu.memory_space<vmem>>, vector<1x16x128xf32>
    %204 = vector.shape_cast %203 : vector<1x16x128xf32> to vector<16x128xf32>
    %205 = vector.broadcast %10 : vector<1x128xf32> to vector<16x128xf32>
    %206 = arith.mulf %204, %205 : vector<16x128xf32>
    %207 = arith.addf %201, %206 : vector<16x128xf32>
    %208 = arith.subf %207, %199 : vector<16x128xf32>
    %cst_122 = arith.constant 0.000000e+00 : f32
    %209 = vector.broadcast %cst_122 : f32 to vector<16x128xf32>
    %210 = arith.cmpf ogt, %208, %209 : vector<16x128xf32>
    %211 = arith.extui %210 : vector<16x128xi1> to vector<16x128xi32>
    %212 = arith.sitofp %211 : vector<16x128xi32> to vector<16x128xf32>
    %213 = arith.mulf %212, %199 : vector<16x128xf32>
    %214 = arith.subf %207, %213 : vector<16x128xf32>
    %c0_123 = arith.constant 0 : index
    %c0_124 = arith.constant 0 : index
    %215 = vector.load %arg17[%c0_123, %c0_124] : memref<16x128xf32, #tpu.memory_space<vmem>>, vector<16x128xf32>
    tpu.vector_store %arg17[%c0_123, %c0_124], %212 {strides = array<i32>} : memref<16x128xf32, #tpu.memory_space<vmem>>, vector<16x128xf32>,
    %c0_125 = arith.constant 0 : index
    %c0_126 = arith.constant 0 : index
    %216 = vector.load %arg18[%c0_125, %c0_126] : memref<16x128xf32, #tpu.memory_space<vmem>>, vector<16x128xf32>
    tpu.vector_store %arg18[%c0_125, %c0_126], %214 {strides = array<i32>} : memref<16x128xf32, #tpu.memory_space<vmem>>, vector<16x128xf32>,
    %c0_127 = arith.constant 0 : index
    %c0_128 = arith.constant 0 : index
    %217 = vector.load %arg19[%c0_127, %c0_128] : memref<16x128xf32, #tpu.memory_space<vmem>>, vector<16x128xf32>
    tpu.vector_store %arg19[%c0_127, %c0_128], %195 {strides = array<i32>} : memref<16x128xf32, #tpu.memory_space<vmem>>, vector<16x128xf32>,
    %218 = arith.truncf %212 : vector<16x128xf32> to vector<16x128xbf16>
    %219 = arith.index_cast %c5_i32 : i32 to index
    %c0_129 = arith.constant 0 : index
    %c0_130 = arith.constant 0 : index
    %220 = vector.load %arg9[%219, %c0_129, %c0_130] : memref<12x16x128xbf16, #tpu.memory_space<vmem>>, vector<1x16x128xbf16>
    %221 = vector.shape_cast %220 : vector<1x16x128xbf16> to vector<16x128xbf16>
    %222 = vector.shape_cast %218 : vector<16x128xbf16> to vector<1x16x128xbf16>
    tpu.vector_store %arg9[%219, %c0_129, %c0_130], %222 {strides = array<i32>} : memref<12x16x128xbf16, #tpu.memory_space<vmem>>, vector<1x16x128xbf16>,
    %c6_i32 = arith.constant 6 : i32
    %c0_131 = arith.constant 0 : index
    %c0_132 = arith.constant 0 : index
    %223 = vector.load %arg17[%c0_131, %c0_132] : memref<16x128xf32, #tpu.memory_space<vmem>>, vector<16x128xf32>
    %c0_133 = arith.constant 0 : index
    %c0_134 = arith.constant 0 : index
    %224 = vector.load %arg18[%c0_133, %c0_134] : memref<16x128xf32, #tpu.memory_space<vmem>>, vector<16x128xf32>
    %c0_135 = arith.constant 0 : index
    %c0_136 = arith.constant 0 : index
    %225 = vector.load %arg19[%c0_135, %c0_136] : memref<16x128xf32, #tpu.memory_space<vmem>>, vector<16x128xf32>
    %226 = vector.broadcast %11 : vector<1x128xf32> to vector<16x128xf32>
    %227 = arith.mulf %225, %226 : vector<16x128xf32>
    %228 = vector.broadcast %12 : vector<1x128xf32> to vector<16x128xf32>
    %229 = arith.mulf %223, %228 : vector<16x128xf32>
    %230 = arith.addf %227, %229 : vector<16x128xf32>
    %cst_137 = arith.constant 1.800000e+00 : f32
    %231 = vector.broadcast %cst_137 : f32 to vector<16x128xf32>
    %232 = arith.mulf %230, %231 : vector<16x128xf32>
    %cst_138 = arith.constant 0.00999999977 : f32
    %233 = vector.broadcast %cst_138 : f32 to vector<16x128xf32>
    %234 = arith.addf %233, %232 : vector<16x128xf32>
    %235 = vector.broadcast %9 : vector<1x128xf32> to vector<16x128xf32>
    %236 = arith.mulf %224, %235 : vector<16x128xf32>
    %237 = arith.index_cast %c6_i32 : i32 to index
    %c0_139 = arith.constant 0 : index
    %c0_140 = arith.constant 0 : index
    %238 = vector.load %arg16[%237, %c0_139, %c0_140] : memref<12x16x128xf32, #tpu.memory_space<vmem>>, vector<1x16x128xf32>
    %239 = vector.shape_cast %238 : vector<1x16x128xf32> to vector<16x128xf32>
    %240 = vector.broadcast %10 : vector<1x128xf32> to vector<16x128xf32>
    %241 = arith.mulf %239, %240 : vector<16x128xf32>
    %242 = arith.addf %236, %241 : vector<16x128xf32>
    %243 = arith.subf %242, %234 : vector<16x128xf32>
    %cst_141 = arith.constant 0.000000e+00 : f32
    %244 = vector.broadcast %cst_141 : f32 to vector<16x128xf32>
    %245 = arith.cmpf ogt, %243, %244 : vector<16x128xf32>
    %246 = arith.extui %245 : vector<16x128xi1> to vector<16x128xi32>
    %247 = arith.sitofp %246 : vector<16x128xi32> to vector<16x128xf32>
    %248 = arith.mulf %247, %234 : vector<16x128xf32>
    %249 = arith.subf %242, %248 : vector<16x128xf32>
    %c0_142 = arith.constant 0 : index
    %c0_143 = arith.constant 0 : index
    %250 = vector.load %arg17[%c0_142, %c0_143] : memref<16x128xf32, #tpu.memory_space<vmem>>, vector<16x128xf32>
    tpu.vector_store %arg17[%c0_142, %c0_143], %247 {strides = array<i32>} : memref<16x128xf32, #tpu.memory_space<vmem>>, vector<16x128xf32>,
    %c0_144 = arith.constant 0 : index
    %c0_145 = arith.constant 0 : index
    %251 = vector.load %arg18[%c0_144, %c0_145] : memref<16x128xf32, #tpu.memory_space<vmem>>, vector<16x128xf32>
    tpu.vector_store %arg18[%c0_144, %c0_145], %249 {strides = array<i32>} : memref<16x128xf32, #tpu.memory_space<vmem>>, vector<16x128xf32>,
    %c0_146 = arith.constant 0 : index
    %c0_147 = arith.constant 0 : index
    %252 = vector.load %arg19[%c0_146, %c0_147] : memref<16x128xf32, #tpu.memory_space<vmem>>, vector<16x128xf32>
    tpu.vector_store %arg19[%c0_146, %c0_147], %230 {strides = array<i32>} : memref<16x128xf32, #tpu.memory_space<vmem>>, vector<16x128xf32>,
    %253 = arith.truncf %247 : vector<16x128xf32> to vector<16x128xbf16>
    %254 = arith.index_cast %c6_i32 : i32 to index
    %c0_148 = arith.constant 0 : index
    %c0_149 = arith.constant 0 : index
    %255 = vector.load %arg9[%254, %c0_148, %c0_149] : memref<12x16x128xbf16, #tpu.memory_space<vmem>>, vector<1x16x128xbf16>
    %256 = vector.shape_cast %255 : vector<1x16x128xbf16> to vector<16x128xbf16>
    %257 = vector.shape_cast %253 : vector<16x128xbf16> to vector<1x16x128xbf16>
    tpu.vector_store %arg9[%254, %c0_148, %c0_149], %257 {strides = array<i32>} : memref<12x16x128xbf16, #tpu.memory_space<vmem>>, vector<1x16x128xbf16>,
    %c7_i32 = arith.constant 7 : i32
    %c0_150 = arith.constant 0 : index
    %c0_151 = arith.constant 0 : index
    %258 = vector.load %arg17[%c0_150, %c0_151] : memref<16x128xf32, #tpu.memory_space<vmem>>, vector<16x128xf32>
    %c0_152 = arith.constant 0 : index
    %c0_153 = arith.constant 0 : index
    %259 = vector.load %arg18[%c0_152, %c0_153] : memref<16x128xf32, #tpu.memory_space<vmem>>, vector<16x128xf32>
    %c0_154 = arith.constant 0 : index
    %c0_155 = arith.constant 0 : index
    %260 = vector.load %arg19[%c0_154, %c0_155] : memref<16x128xf32, #tpu.memory_space<vmem>>, vector<16x128xf32>
    %261 = vector.broadcast %11 : vector<1x128xf32> to vector<16x128xf32>
    %262 = arith.mulf %260, %261 : vector<16x128xf32>
    %263 = vector.broadcast %12 : vector<1x128xf32> to vector<16x128xf32>
    %264 = arith.mulf %258, %263 : vector<16x128xf32>
    %265 = arith.addf %262, %264 : vector<16x128xf32>
    %cst_156 = arith.constant 1.800000e+00 : f32
    %266 = vector.broadcast %cst_156 : f32 to vector<16x128xf32>
    %267 = arith.mulf %265, %266 : vector<16x128xf32>
    %cst_157 = arith.constant 0.00999999977 : f32
    %268 = vector.broadcast %cst_157 : f32 to vector<16x128xf32>
    %269 = arith.addf %268, %267 : vector<16x128xf32>
    %270 = vector.broadcast %9 : vector<1x128xf32> to vector<16x128xf32>
    %271 = arith.mulf %259, %270 : vector<16x128xf32>
    %272 = arith.index_cast %c7_i32 : i32 to index
    %c0_158 = arith.constant 0 : index
    %c0_159 = arith.constant 0 : index
    %273 = vector.load %arg16[%272, %c0_158, %c0_159] : memref<12x16x128xf32, #tpu.memory_space<vmem>>, vector<1x16x128xf32>
    %274 = vector.shape_cast %273 : vector<1x16x128xf32> to vector<16x128xf32>
    %275 = vector.broadcast %10 : vector<1x128xf32> to vector<16x128xf32>
    %276 = arith.mulf %274, %275 : vector<16x128xf32>
    %277 = arith.addf %271, %276 : vector<16x128xf32>
    %278 = arith.subf %277, %269 : vector<16x128xf32>
    %cst_160 = arith.constant 0.000000e+00 : f32
    %279 = vector.broadcast %cst_160 : f32 to vector<16x128xf32>
    %280 = arith.cmpf ogt, %278, %279 : vector<16x128xf32>
    %281 = arith.extui %280 : vector<16x128xi1> to vector<16x128xi32>
    %282 = arith.sitofp %281 : vector<16x128xi32> to vector<16x128xf32>
    %283 = arith.mulf %282, %269 : vector<16x128xf32>
    %284 = arith.subf %277, %283 : vector<16x128xf32>
    %c0_161 = arith.constant 0 : index
    %c0_162 = arith.constant 0 : index
    %285 = vector.load %arg17[%c0_161, %c0_162] : memref<16x128xf32, #tpu.memory_space<vmem>>, vector<16x128xf32>
    tpu.vector_store %arg17[%c0_161, %c0_162], %282 {strides = array<i32>} : memref<16x128xf32, #tpu.memory_space<vmem>>, vector<16x128xf32>,
    %c0_163 = arith.constant 0 : index
    %c0_164 = arith.constant 0 : index
    %286 = vector.load %arg18[%c0_163, %c0_164] : memref<16x128xf32, #tpu.memory_space<vmem>>, vector<16x128xf32>
    tpu.vector_store %arg18[%c0_163, %c0_164], %284 {strides = array<i32>} : memref<16x128xf32, #tpu.memory_space<vmem>>, vector<16x128xf32>,
    %c0_165 = arith.constant 0 : index
    %c0_166 = arith.constant 0 : index
    %287 = vector.load %arg19[%c0_165, %c0_166] : memref<16x128xf32, #tpu.memory_space<vmem>>, vector<16x128xf32>
    tpu.vector_store %arg19[%c0_165, %c0_166], %265 {strides = array<i32>} : memref<16x128xf32, #tpu.memory_space<vmem>>, vector<16x128xf32>,
    %288 = arith.truncf %282 : vector<16x128xf32> to vector<16x128xbf16>
    %289 = arith.index_cast %c7_i32 : i32 to index
    %c0_167 = arith.constant 0 : index
    %c0_168 = arith.constant 0 : index
    %290 = vector.load %arg9[%289, %c0_167, %c0_168] : memref<12x16x128xbf16, #tpu.memory_space<vmem>>, vector<1x16x128xbf16>
    %291 = vector.shape_cast %290 : vector<1x16x128xbf16> to vector<16x128xbf16>
    %292 = vector.shape_cast %288 : vector<16x128xbf16> to vector<1x16x128xbf16>
    tpu.vector_store %arg9[%289, %c0_167, %c0_168], %292 {strides = array<i32>} : memref<12x16x128xbf16, #tpu.memory_space<vmem>>, vector<1x16x128xbf16>,
    %c8_i32 = arith.constant 8 : i32
    %c0_169 = arith.constant 0 : index
    %c0_170 = arith.constant 0 : index
    %293 = vector.load %arg17[%c0_169, %c0_170] : memref<16x128xf32, #tpu.memory_space<vmem>>, vector<16x128xf32>
    %c0_171 = arith.constant 0 : index
    %c0_172 = arith.constant 0 : index
    %294 = vector.load %arg18[%c0_171, %c0_172] : memref<16x128xf32, #tpu.memory_space<vmem>>, vector<16x128xf32>
    %c0_173 = arith.constant 0 : index
    %c0_174 = arith.constant 0 : index
    %295 = vector.load %arg19[%c0_173, %c0_174] : memref<16x128xf32, #tpu.memory_space<vmem>>, vector<16x128xf32>
    %296 = vector.broadcast %11 : vector<1x128xf32> to vector<16x128xf32>
    %297 = arith.mulf %295, %296 : vector<16x128xf32>
    %298 = vector.broadcast %12 : vector<1x128xf32> to vector<16x128xf32>
    %299 = arith.mulf %293, %298 : vector<16x128xf32>
    %300 = arith.addf %297, %299 : vector<16x128xf32>
    %cst_175 = arith.constant 1.800000e+00 : f32
    %301 = vector.broadcast %cst_175 : f32 to vector<16x128xf32>
    %302 = arith.mulf %300, %301 : vector<16x128xf32>
    %cst_176 = arith.constant 0.00999999977 : f32
    %303 = vector.broadcast %cst_176 : f32 to vector<16x128xf32>
    %304 = arith.addf %303, %302 : vector<16x128xf32>
    %305 = vector.broadcast %9 : vector<1x128xf32> to vector<16x128xf32>
    %306 = arith.mulf %294, %305 : vector<16x128xf32>
    %307 = arith.index_cast %c8_i32 : i32 to index
    %c0_177 = arith.constant 0 : index
    %c0_178 = arith.constant 0 : index
    %308 = vector.load %arg16[%307, %c0_177, %c0_178] : memref<12x16x128xf32, #tpu.memory_space<vmem>>, vector<1x16x128xf32>
    %309 = vector.shape_cast %308 : vector<1x16x128xf32> to vector<16x128xf32>
    %310 = vector.broadcast %10 : vector<1x128xf32> to vector<16x128xf32>
    %311 = arith.mulf %309, %310 : vector<16x128xf32>
    %312 = arith.addf %306, %311 : vector<16x128xf32>
    %313 = arith.subf %312, %304 : vector<16x128xf32>
    %cst_179 = arith.constant 0.000000e+00 : f32
    %314 = vector.broadcast %cst_179 : f32 to vector<16x128xf32>
    %315 = arith.cmpf ogt, %313, %314 : vector<16x128xf32>
    %316 = arith.extui %315 : vector<16x128xi1> to vector<16x128xi32>
    %317 = arith.sitofp %316 : vector<16x128xi32> to vector<16x128xf32>
    %318 = arith.mulf %317, %304 : vector<16x128xf32>
    %319 = arith.subf %312, %318 : vector<16x128xf32>
    %c0_180 = arith.constant 0 : index
    %c0_181 = arith.constant 0 : index
    %320 = vector.load %arg17[%c0_180, %c0_181] : memref<16x128xf32, #tpu.memory_space<vmem>>, vector<16x128xf32>
    tpu.vector_store %arg17[%c0_180, %c0_181], %317 {strides = array<i32>} : memref<16x128xf32, #tpu.memory_space<vmem>>, vector<16x128xf32>,
    %c0_182 = arith.constant 0 : index
    %c0_183 = arith.constant 0 : index
    %321 = vector.load %arg18[%c0_182, %c0_183] : memref<16x128xf32, #tpu.memory_space<vmem>>, vector<16x128xf32>
    tpu.vector_store %arg18[%c0_182, %c0_183], %319 {strides = array<i32>} : memref<16x128xf32, #tpu.memory_space<vmem>>, vector<16x128xf32>,
    %c0_184 = arith.constant 0 : index
    %c0_185 = arith.constant 0 : index
    %322 = vector.load %arg19[%c0_184, %c0_185] : memref<16x128xf32, #tpu.memory_space<vmem>>, vector<16x128xf32>
    tpu.vector_store %arg19[%c0_184, %c0_185], %300 {strides = array<i32>} : memref<16x128xf32, #tpu.memory_space<vmem>>, vector<16x128xf32>,
    %323 = arith.truncf %317 : vector<16x128xf32> to vector<16x128xbf16>
    %324 = arith.index_cast %c8_i32 : i32 to index
    %c0_186 = arith.constant 0 : index
    %c0_187 = arith.constant 0 : index
    %325 = vector.load %arg9[%324, %c0_186, %c0_187] : memref<12x16x128xbf16, #tpu.memory_space<vmem>>, vector<1x16x128xbf16>
    %326 = vector.shape_cast %325 : vector<1x16x128xbf16> to vector<16x128xbf16>
    %327 = vector.shape_cast %323 : vector<16x128xbf16> to vector<1x16x128xbf16>
    tpu.vector_store %arg9[%324, %c0_186, %c0_187], %327 {strides = array<i32>} : memref<12x16x128xbf16, #tpu.memory_space<vmem>>, vector<1x16x128xbf16>,
    %c9_i32 = arith.constant 9 : i32
    %c0_188 = arith.constant 0 : index
    %c0_189 = arith.constant 0 : index
    %328 = vector.load %arg17[%c0_188, %c0_189] : memref<16x128xf32, #tpu.memory_space<vmem>>, vector<16x128xf32>
    %c0_190 = arith.constant 0 : index
    %c0_191 = arith.constant 0 : index
    %329 = vector.load %arg18[%c0_190, %c0_191] : memref<16x128xf32, #tpu.memory_space<vmem>>, vector<16x128xf32>
    %c0_192 = arith.constant 0 : index
    %c0_193 = arith.constant 0 : index
    %330 = vector.load %arg19[%c0_192, %c0_193] : memref<16x128xf32, #tpu.memory_space<vmem>>, vector<16x128xf32>
    %331 = vector.broadcast %11 : vector<1x128xf32> to vector<16x128xf32>
    %332 = arith.mulf %330, %331 : vector<16x128xf32>
    %333 = vector.broadcast %12 : vector<1x128xf32> to vector<16x128xf32>
    %334 = arith.mulf %328, %333 : vector<16x128xf32>
    %335 = arith.addf %332, %334 : vector<16x128xf32>
    %cst_194 = arith.constant 1.800000e+00 : f32
    %336 = vector.broadcast %cst_194 : f32 to vector<16x128xf32>
    %337 = arith.mulf %335, %336 : vector<16x128xf32>
    %cst_195 = arith.constant 0.00999999977 : f32
    %338 = vector.broadcast %cst_195 : f32 to vector<16x128xf32>
    %339 = arith.addf %338, %337 : vector<16x128xf32>
    %340 = vector.broadcast %9 : vector<1x128xf32> to vector<16x128xf32>
    %341 = arith.mulf %329, %340 : vector<16x128xf32>
    %342 = arith.index_cast %c9_i32 : i32 to index
    %c0_196 = arith.constant 0 : index
    %c0_197 = arith.constant 0 : index
    %343 = vector.load %arg16[%342, %c0_196, %c0_197] : memref<12x16x128xf32, #tpu.memory_space<vmem>>, vector<1x16x128xf32>
    %344 = vector.shape_cast %343 : vector<1x16x128xf32> to vector<16x128xf32>
    %345 = vector.broadcast %10 : vector<1x128xf32> to vector<16x128xf32>
    %346 = arith.mulf %344, %345 : vector<16x128xf32>
    %347 = arith.addf %341, %346 : vector<16x128xf32>
    %348 = arith.subf %347, %339 : vector<16x128xf32>
    %cst_198 = arith.constant 0.000000e+00 : f32
    %349 = vector.broadcast %cst_198 : f32 to vector<16x128xf32>
    %350 = arith.cmpf ogt, %348, %349 : vector<16x128xf32>
    %351 = arith.extui %350 : vector<16x128xi1> to vector<16x128xi32>
    %352 = arith.sitofp %351 : vector<16x128xi32> to vector<16x128xf32>
    %353 = arith.mulf %352, %339 : vector<16x128xf32>
    %354 = arith.subf %347, %353 : vector<16x128xf32>
    %c0_199 = arith.constant 0 : index
    %c0_200 = arith.constant 0 : index
    %355 = vector.load %arg17[%c0_199, %c0_200] : memref<16x128xf32, #tpu.memory_space<vmem>>, vector<16x128xf32>
    tpu.vector_store %arg17[%c0_199, %c0_200], %352 {strides = array<i32>} : memref<16x128xf32, #tpu.memory_space<vmem>>, vector<16x128xf32>,
    %c0_201 = arith.constant 0 : index
    %c0_202 = arith.constant 0 : index
    %356 = vector.load %arg18[%c0_201, %c0_202] : memref<16x128xf32, #tpu.memory_space<vmem>>, vector<16x128xf32>
    tpu.vector_store %arg18[%c0_201, %c0_202], %354 {strides = array<i32>} : memref<16x128xf32, #tpu.memory_space<vmem>>, vector<16x128xf32>,
    %c0_203 = arith.constant 0 : index
    %c0_204 = arith.constant 0 : index
    %357 = vector.load %arg19[%c0_203, %c0_204] : memref<16x128xf32, #tpu.memory_space<vmem>>, vector<16x128xf32>
    tpu.vector_store %arg19[%c0_203, %c0_204], %335 {strides = array<i32>} : memref<16x128xf32, #tpu.memory_space<vmem>>, vector<16x128xf32>,
    %358 = arith.truncf %352 : vector<16x128xf32> to vector<16x128xbf16>
    %359 = arith.index_cast %c9_i32 : i32 to index
    %c0_205 = arith.constant 0 : index
    %c0_206 = arith.constant 0 : index
    %360 = vector.load %arg9[%359, %c0_205, %c0_206] : memref<12x16x128xbf16, #tpu.memory_space<vmem>>, vector<1x16x128xbf16>
    %361 = vector.shape_cast %360 : vector<1x16x128xbf16> to vector<16x128xbf16>
    %362 = vector.shape_cast %358 : vector<16x128xbf16> to vector<1x16x128xbf16>
    tpu.vector_store %arg9[%359, %c0_205, %c0_206], %362 {strides = array<i32>} : memref<12x16x128xbf16, #tpu.memory_space<vmem>>, vector<1x16x128xbf16>,
    %c10_i32 = arith.constant 10 : i32
    %c0_207 = arith.constant 0 : index
    %c0_208 = arith.constant 0 : index
    %363 = vector.load %arg17[%c0_207, %c0_208] : memref<16x128xf32, #tpu.memory_space<vmem>>, vector<16x128xf32>
    %c0_209 = arith.constant 0 : index
    %c0_210 = arith.constant 0 : index
    %364 = vector.load %arg18[%c0_209, %c0_210] : memref<16x128xf32, #tpu.memory_space<vmem>>, vector<16x128xf32>
    %c0_211 = arith.constant 0 : index
    %c0_212 = arith.constant 0 : index
    %365 = vector.load %arg19[%c0_211, %c0_212] : memref<16x128xf32, #tpu.memory_space<vmem>>, vector<16x128xf32>
    %366 = vector.broadcast %11 : vector<1x128xf32> to vector<16x128xf32>
    %367 = arith.mulf %365, %366 : vector<16x128xf32>
    %368 = vector.broadcast %12 : vector<1x128xf32> to vector<16x128xf32>
    %369 = arith.mulf %363, %368 : vector<16x128xf32>
    %370 = arith.addf %367, %369 : vector<16x128xf32>
    %cst_213 = arith.constant 1.800000e+00 : f32
    %371 = vector.broadcast %cst_213 : f32 to vector<16x128xf32>
    %372 = arith.mulf %370, %371 : vector<16x128xf32>
    %cst_214 = arith.constant 0.00999999977 : f32
    %373 = vector.broadcast %cst_214 : f32 to vector<16x128xf32>
    %374 = arith.addf %373, %372 : vector<16x128xf32>
    %375 = vector.broadcast %9 : vector<1x128xf32> to vector<16x128xf32>
    %376 = arith.mulf %364, %375 : vector<16x128xf32>
    %377 = arith.index_cast %c10_i32 : i32 to index
    %c0_215 = arith.constant 0 : index
    %c0_216 = arith.constant 0 : index
    %378 = vector.load %arg16[%377, %c0_215, %c0_216] : memref<12x16x128xf32, #tpu.memory_space<vmem>>, vector<1x16x128xf32>
    %379 = vector.shape_cast %378 : vector<1x16x128xf32> to vector<16x128xf32>
    %380 = vector.broadcast %10 : vector<1x128xf32> to vector<16x128xf32>
    %381 = arith.mulf %379, %380 : vector<16x128xf32>
    %382 = arith.addf %376, %381 : vector<16x128xf32>
    %383 = arith.subf %382, %374 : vector<16x128xf32>
    %cst_217 = arith.constant 0.000000e+00 : f32
    %384 = vector.broadcast %cst_217 : f32 to vector<16x128xf32>
    %385 = arith.cmpf ogt, %383, %384 : vector<16x128xf32>
    %386 = arith.extui %385 : vector<16x128xi1> to vector<16x128xi32>
    %387 = arith.sitofp %386 : vector<16x128xi32> to vector<16x128xf32>
    %388 = arith.mulf %387, %374 : vector<16x128xf32>
    %389 = arith.subf %382, %388 : vector<16x128xf32>
    %c0_218 = arith.constant 0 : index
    %c0_219 = arith.constant 0 : index
    %390 = vector.load %arg17[%c0_218, %c0_219] : memref<16x128xf32, #tpu.memory_space<vmem>>, vector<16x128xf32>
    tpu.vector_store %arg17[%c0_218, %c0_219], %387 {strides = array<i32>} : memref<16x128xf32, #tpu.memory_space<vmem>>, vector<16x128xf32>,
    %c0_220 = arith.constant 0 : index
    %c0_221 = arith.constant 0 : index
    %391 = vector.load %arg18[%c0_220, %c0_221] : memref<16x128xf32, #tpu.memory_space<vmem>>, vector<16x128xf32>
    tpu.vector_store %arg18[%c0_220, %c0_221], %389 {strides = array<i32>} : memref<16x128xf32, #tpu.memory_space<vmem>>, vector<16x128xf32>,
    %c0_222 = arith.constant 0 : index
    %c0_223 = arith.constant 0 : index
    %392 = vector.load %arg19[%c0_222, %c0_223] : memref<16x128xf32, #tpu.memory_space<vmem>>, vector<16x128xf32>
    tpu.vector_store %arg19[%c0_222, %c0_223], %370 {strides = array<i32>} : memref<16x128xf32, #tpu.memory_space<vmem>>, vector<16x128xf32>,
    %393 = arith.truncf %387 : vector<16x128xf32> to vector<16x128xbf16>
    %394 = arith.index_cast %c10_i32 : i32 to index
    %c0_224 = arith.constant 0 : index
    %c0_225 = arith.constant 0 : index
    %395 = vector.load %arg9[%394, %c0_224, %c0_225] : memref<12x16x128xbf16, #tpu.memory_space<vmem>>, vector<1x16x128xbf16>
    %396 = vector.shape_cast %395 : vector<1x16x128xbf16> to vector<16x128xbf16>
    %397 = vector.shape_cast %393 : vector<16x128xbf16> to vector<1x16x128xbf16>
    tpu.vector_store %arg9[%394, %c0_224, %c0_225], %397 {strides = array<i32>} : memref<12x16x128xbf16, #tpu.memory_space<vmem>>, vector<1x16x128xbf16>,
    %c11_i32 = arith.constant 11 : i32
    %c0_226 = arith.constant 0 : index
    %c0_227 = arith.constant 0 : index
    %398 = vector.load %arg17[%c0_226, %c0_227] : memref<16x128xf32, #tpu.memory_space<vmem>>, vector<16x128xf32>
    %c0_228 = arith.constant 0 : index
    %c0_229 = arith.constant 0 : index
    %399 = vector.load %arg18[%c0_228, %c0_229] : memref<16x128xf32, #tpu.memory_space<vmem>>, vector<16x128xf32>
    %c0_230 = arith.constant 0 : index
    %c0_231 = arith.constant 0 : index
    %400 = vector.load %arg19[%c0_230, %c0_231] : memref<16x128xf32, #tpu.memory_space<vmem>>, vector<16x128xf32>
    %401 = vector.broadcast %11 : vector<1x128xf32> to vector<16x128xf32>
    %402 = arith.mulf %400, %401 : vector<16x128xf32>
    %403 = vector.broadcast %12 : vector<1x128xf32> to vector<16x128xf32>
    %404 = arith.mulf %398, %403 : vector<16x128xf32>
    %405 = arith.addf %402, %404 : vector<16x128xf32>
    %cst_232 = arith.constant 1.800000e+00 : f32
    %406 = vector.broadcast %cst_232 : f32 to vector<16x128xf32>
    %407 = arith.mulf %405, %406 : vector<16x128xf32>
    %cst_233 = arith.constant 0.00999999977 : f32
    %408 = vector.broadcast %cst_233 : f32 to vector<16x128xf32>
    %409 = arith.addf %408, %407 : vector<16x128xf32>
    %410 = vector.broadcast %9 : vector<1x128xf32> to vector<16x128xf32>
    %411 = arith.mulf %399, %410 : vector<16x128xf32>
    %412 = arith.index_cast %c11_i32 : i32 to index
    %c0_234 = arith.constant 0 : index
    %c0_235 = arith.constant 0 : index
    %413 = vector.load %arg16[%412, %c0_234, %c0_235] : memref<12x16x128xf32, #tpu.memory_space<vmem>>, vector<1x16x128xf32>
    %414 = vector.shape_cast %413 : vector<1x16x128xf32> to vector<16x128xf32>
    %415 = vector.broadcast %10 : vector<1x128xf32> to vector<16x128xf32>
    %416 = arith.mulf %414, %415 : vector<16x128xf32>
    %417 = arith.addf %411, %416 : vector<16x128xf32>
    %418 = arith.subf %417, %409 : vector<16x128xf32>
    %cst_236 = arith.constant 0.000000e+00 : f32
    %419 = vector.broadcast %cst_236 : f32 to vector<16x128xf32>
    %420 = arith.cmpf ogt, %418, %419 : vector<16x128xf32>
    %421 = arith.extui %420 : vector<16x128xi1> to vector<16x128xi32>
    %422 = arith.sitofp %421 : vector<16x128xi32> to vector<16x128xf32>
    %423 = arith.mulf %422, %409 : vector<16x128xf32>
    %424 = arith.subf %417, %423 : vector<16x128xf32>
    %c0_237 = arith.constant 0 : index
    %c0_238 = arith.constant 0 : index
    %425 = vector.load %arg17[%c0_237, %c0_238] : memref<16x128xf32, #tpu.memory_space<vmem>>, vector<16x128xf32>
    tpu.vector_store %arg17[%c0_237, %c0_238], %422 {strides = array<i32>} : memref<16x128xf32, #tpu.memory_space<vmem>>, vector<16x128xf32>,
    %c0_239 = arith.constant 0 : index
    %c0_240 = arith.constant 0 : index
    %426 = vector.load %arg18[%c0_239, %c0_240] : memref<16x128xf32, #tpu.memory_space<vmem>>, vector<16x128xf32>
    tpu.vector_store %arg18[%c0_239, %c0_240], %424 {strides = array<i32>} : memref<16x128xf32, #tpu.memory_space<vmem>>, vector<16x128xf32>,
    %c0_241 = arith.constant 0 : index
    %c0_242 = arith.constant 0 : index
    %427 = vector.load %arg19[%c0_241, %c0_242] : memref<16x128xf32, #tpu.memory_space<vmem>>, vector<16x128xf32>
    tpu.vector_store %arg19[%c0_241, %c0_242], %405 {strides = array<i32>} : memref<16x128xf32, #tpu.memory_space<vmem>>, vector<16x128xf32>,
    %428 = arith.truncf %422 : vector<16x128xf32> to vector<16x128xbf16>
    %429 = arith.index_cast %c11_i32 : i32 to index
    %c0_243 = arith.constant 0 : index
    %c0_244 = arith.constant 0 : index
    %430 = vector.load %arg9[%429, %c0_243, %c0_244] : memref<12x16x128xbf16, #tpu.memory_space<vmem>>, vector<1x16x128xbf16>
    %431 = vector.shape_cast %430 : vector<1x16x128xbf16> to vector<16x128xbf16>
    %432 = vector.shape_cast %428 : vector<16x128xbf16> to vector<1x16x128xbf16>
    tpu.vector_store %arg9[%429, %c0_243, %c0_244], %432 {strides = array<i32>} : memref<12x16x128xbf16, #tpu.memory_space<vmem>>, vector<1x16x128xbf16>,
    %c12_i32 = arith.constant 12 : i32
    %c0_i32_245 = arith.constant 0 : i32
    %433 = arith.cmpi eq, %arg1, %c0_i32_245 : i32
    %434 = arith.extui %433 : i1 to i32
    %c0_i32_246 = arith.constant 0 : i32
    %435 = arith.cmpi ne, %434, %c0_i32_246 : i32
    scf.if %435 {
      %c0_247 = arith.constant 0 : index
      %c0_248 = arith.constant 0 : index
      %436 = vector.load %arg18[%c0_247, %c0_248] : memref<16x128xf32, #tpu.memory_space<vmem>>, vector<16x128xf32>
      %c0_249 = arith.constant 0 : index
      %c0_250 = arith.constant 0 : index
      %437 = vector.load %arg10[%c0_249, %c0_250] : memref<16x128xf32, #tpu.memory_space<vmem>>, vector<16x128xf32>
      tpu.vector_store %arg10[%c0_249, %c0_250], %436 {strides = array<i32>} : memref<16x128xf32, #tpu.memory_space<vmem>>, vector<16x128xf32>,
      %c0_251 = arith.constant 0 : index
      %c0_252 = arith.constant 0 : index
      %438 = vector.load %arg19[%c0_251, %c0_252] : memref<16x128xf32, #tpu.memory_space<vmem>>, vector<16x128xf32>
      %c0_253 = arith.constant 0 : index
      %c0_254 = arith.constant 0 : index
      %439 = vector.load %arg11[%c0_253, %c0_254] : memref<16x128xf32, #tpu.memory_space<vmem>>, vector<16x128xf32>
      tpu.vector_store %arg11[%c0_253, %c0_254], %438 {strides = array<i32>} : memref<16x128xf32, #tpu.memory_space<vmem>>, vector<16x128xf32>,
    } else {
    }
    return
  }
  func.func @transform_0(%arg0: i32, %arg1: i32) -> (i32, i32, i32) {
    %c0_i32 = arith.constant 0 : i32
    %c0_i32_0 = arith.constant 0 : i32
    return %arg1, %arg0, %c0_i32 : i32, i32, i32
  }
  func.func @transform_1(%arg0: i32, %arg1: i32) -> (i32, i32) {
    %c0_i32 = arith.constant 0 : i32
    %c0_i32_0 = arith.constant 0 : i32
    %c0_i32_1 = arith.constant 0 : i32
    return %c0_i32, %c0_i32_0 : i32, i32
  }
  func.func @transform_2(%arg0: i32, %arg1: i32) -> (i32, i32) {
    %c0_i32 = arith.constant 0 : i32
    %c0_i32_0 = arith.constant 0 : i32
    %c0_i32_1 = arith.constant 0 : i32
    return %c0_i32, %c0_i32_0 : i32, i32
  }
  func.func @transform_3(%arg0: i32, %arg1: i32) -> (i32, i32) {
    %c0_i32 = arith.constant 0 : i32
    %c0_i32_0 = arith.constant 0 : i32
    %c0_i32_1 = arith.constant 0 : i32
    return %c0_i32, %c0_i32_0 : i32, i32
  }
  func.func @transform_4(%arg0: i32, %arg1: i32) -> (i32, i32) {
    %c0_i32 = arith.constant 0 : i32
    %c0_i32_0 = arith.constant 0 : i32
    return %arg0, %c0_i32 : i32, i32
  }
  func.func @transform_5(%arg0: i32, %arg1: i32) -> (i32, i32) {
    %c0_i32 = arith.constant 0 : i32
    %c0_i32_0 = arith.constant 0 : i32
    return %arg0, %c0_i32 : i32, i32
  }
  func.func @transform_6(%arg0: i32, %arg1: i32) -> (i32, i32) {
    %c0_i32 = arith.constant 0 : i32
    %c0_i32_0 = arith.constant 0 : i32
    return %arg0, %c0_i32 : i32, i32
  }
  func.func @transform_7(%arg0: i32, %arg1: i32) -> (i32, i32, i32) {
    %c0_i32 = arith.constant 0 : i32
    %c0_i32_0 = arith.constant 0 : i32
    return %arg1, %arg0, %c0_i32 : i32, i32, i32
  }
  func.func @transform_8(%arg0: i32, %arg1: i32) -> (i32, i32) {
    %c0_i32 = arith.constant 0 : i32
    %c0_i32_0 = arith.constant 0 : i32
    return %arg0, %c0_i32 : i32, i32
  }
  func.func @transform_9(%arg0: i32, %arg1: i32) -> (i32, i32) {
    %c0_i32 = arith.constant 0 : i32
    %c0_i32_0 = arith.constant 0 : i32
    return %arg0, %c0_i32 : i32, i32
  }
}

</mosaic_0001>

<bundles_post_ra>
// kernel: tpu_custom_call.1
= control target key start
LH: loop header
LB: loop body
LE: loop exit
PB: predicated region body
PF: predicated region fallthrough
CT: control target
= control target key end

     0   :  { %15 = vsyncpa [#allocation11], 0  ;;  %s1924_s0 = inlined_call_operand.hbm [shape: bf16[12,16,128], index: 0, kind: input, shape index: {}]   ;;  %s1925_s1 = inlined_call_operand.vmem [shape: bf16[128,128], index: 1, kind: input, shape index: {}]   ;;  %s1926_s2 = inlined_call_operand.vmem [shape: f32[1,128], index: 2, kind: input, shape index: {}]   ;;  %s1927_s3 = inlined_call_operand.vmem [shape: f32[1,128], index: 3, kind: input, shape index: {}]   ;;  %s1928_s4 = inlined_call_operand.vmem [shape: f32[16,128], index: 4, kind: input, shape index: {}]   ;;  %s1929_s5 = inlined_call_operand.hbm [shape: f32[16,128], index: 5, kind: input, shape index: {}, may-alias: {5,8}]   ;;  %s1930_s6 = inlined_call_operand.hbm [shape: f32[16,128], index: 6, kind: input, shape index: {}, may-alias: {6,9}]   ;;  %s1931_s7 = inlined_call_operand.hbm [shape: bf16[12,16,128], index: 7, kind: output, shape index: {0}]   ;;  %s1932_s8 = inlined_call_operand.hbm [shape: f32[16,128], index: 8, kind: output, shape index: {1}, may-alias: {5,8}]   ;;  %s1933_s9 = inlined_call_operand.hbm [shape: f32[16,128], index: 9, kind: output, shape index: {2}, may-alias: {6,9}]  }
   0x1   :  { %16 = vsyncpa [#allocation14], 0 }
   0x2   :  { %17 = vsyncpa [#allocation12], 0 }
   0x3   :  { %18 = vsyncpa [#allocation18], 0  ;;  %s1541_s30 = smov [#allocation13]   ;;  %s1401_s13 = scalar_lea.hbm %s1929_s5, 256 }
   0x4   :  { %s44_s10 = sshll.u32 %s1541_s30, 4  ;;  %p1402_p0 = scmp.ne.s32.totalorder %s1929_s5, %s1401_s13  ;;  %s45_s10 = int_to_ptr.vmem [resolvable:$true] %s44_s10 }
   0x5   :  { %p1405_p1 = scmp.lt.u32.totalorder %s1401_s13, %s1929_s5 }
   0x7   :  { %p1407_p2 = pnand %p1405_p1, %p1402_p0 }
   0x9   :  { %1410 = shalt.err (!%p1407_p2)
}
   0xa   :  { %s1411_s18 = scalar_lea.vmem %s45_s10, 256  ;;  %p1416_p4 = scmp.lt.s32.totalorder %s45_s10, %s45_s10 }
   0xb   :  { %p1412_p3 = scmp.ne.s32.totalorder %s45_s10, %s1411_s18  ;;  %p1417_p5 = scmp.lt.s32.totalorder %s1411_s18, %s1411_s18 }
   0xd   :  { %p1418_p6 = por %p1417_p5, %p1416_p4 }
   0xf   :  { %p1419_p7 = pnand %p1418_p6, %p1412_p3 }
  0x11   :  { %1422 = shalt.err (!%p1419_p7)
}
  0x12   :  { %s1542_s19 = smov 128   ;;  %s1543_s20 = smov 8  }
  0x13   :  { %50 = dma.hbm_to_vmem [thread:$0]  %s1929_s5, 256, %s45_s10, [#allocation14], %s1542_s19, %s1542_s19, %s1543_s20  }
  0x14   :  { %s1544_s23 = smov [#allocation10]   ;;  %s1423_s27 = scalar_lea.hbm %s1924_s0, 1536 }
  0x15   :  { %s24_s24 = sshll.u32 %s1544_s23, 4  ;;  %p1424_p8 = scmp.ne.s32.totalorder %s1924_s0, %s1423_s27  ;;  %s25_s24 = int_to_ptr.vmem [resolvable:$true] %s24_s24 }
  0x16   :  { %p1427_p9 = scmp.lt.u32.totalorder %s1423_s27, %s1924_s0 }
  0x18   :  { %p1429_p10 = pnand %p1427_p9, %p1424_p8 }
  0x1a   :  { %1432 = shalt.err (!%p1429_p10)
}
  0x1b   :  { %s1433_s12 = scalar_lea.vmem %s25_s24, 1536  ;;  %p1438_p12 = scmp.lt.s32.totalorder %s25_s24, %s25_s24 }
  0x1c   :  { %p1434_p11 = scmp.ne.s32.totalorder %s25_s24, %s1433_s12  ;;  %p1439_p13 = scmp.lt.s32.totalorder %s1433_s12, %s1433_s12 }
  0x1e   :  { %p1440_p0 = por %p1439_p13, %p1438_p12 }
  0x20   :  { %p1441_p1 = pnand %p1440_p0, %p1434_p11 }
  0x22   :  { %1444 = shalt.err (!%p1441_p1)
}
  0x23   :  { %s1545_s5 = smov 64   ;;  %s1546_s10 = smov 4  }
  0x24   :  { %30 = dma.hbm_to_vmem [thread:$0]  %s1924_s0, 1536, %s25_s24, [#allocation11], %s1545_s5, %s1545_s5, %s1546_s10  }
  0x25   :  { %s1547_s15 = smov [#allocation15]   ;;  %s1445_s21 = scalar_lea.hbm %s1930_s6, 256 }
  0x26   :  { %s56_s16 = sshll.u32 %s1547_s15, 4  ;;  %p1446_p2 = scmp.ne.s32.totalorder %s1930_s6, %s1445_s21  ;;  %s57_s16 = int_to_ptr.vmem [resolvable:$true] %s56_s16 }
  0x27   :  { %p1449_p3 = scmp.lt.u32.totalorder %s1445_s21, %s1930_s6 }
  0x29   :  { %p1451_p4 = pnand %p1449_p3, %p1446_p2 }
  0x2b   :  { %1454 = shalt.err (!%p1451_p4)
}
  0x2c   :  { %s1455_s27 = scalar_lea.vmem %s57_s16, 256  ;;  %p1460_p6 = scmp.lt.s32.totalorder %s57_s16, %s57_s16 }
  0x2d   :  { %p1456_p5 = scmp.ne.s32.totalorder %s57_s16, %s1455_s27  ;;  %p1461_p7 = scmp.lt.s32.totalorder %s1455_s27, %s1455_s27 }
  0x2f   :  { %p1462_p8 = por %p1461_p7, %p1460_p6 }
  0x31   :  { %p1463_p9 = pnand %p1462_p8, %p1456_p5 }
  0x33   :  { %1466 = shalt.err (!%p1463_p9)
}
  0x34   :  { %62 = dma.hbm_to_vmem [thread:$0]  %s1930_s6, 256, %s57_s16, [#allocation14], %s1542_s19, %s1542_s19, %s1543_s20  }
  0x35   :  { %1533 = dma.done.wait [#allocation11], 1536  }
  0x36   :  { %1534 = vsyncadd [#allocation11], 4294965760 }
  0x37   :  { %1535 = dma.done.wait [#allocation14], 512  }
  0x38   :  { %1536 = vsyncadd [#allocation14], 4294966784  ;;  %v1373_v0 = vld [vmem:[%s1925_s1] sm:$0xff]   ;;  %v1374_v1 = vld [vmem:[%s1925_s1 + $0x8] sm:$0xff]   ;;  %s1550_s30 = smov [#allocation17]   ;;  %s1551_s12 = smov [#allocation19]  }
  0x39   :  { %1306 = vmatprep.subr.bf16.mxu0 %v1373_v0  ;;  %1346 = vmatprep.subr.bf16.mxu1 %v1373_v0  ;;  %v1375_v2 = vld [vmem:[%s1925_s1 + $0x10] sm:$0xff]   ;;  %v1376_v3 = vld [vmem:[%s1925_s1 + $0x18] sm:$0xff]   ;;  %v1381_v4 = vld [vmem:[#allocation10] sm:$0xff]   ;;  %s1122_s11 = sshll.u32 %s1550_s30, 4  ;;  %s1134_s13 = sshll.u32 %s1551_s12, 4  ;;  %s1865_s11 = int_to_ptr.vmem [resolvable:$true] %s1122_s11  ;;  %s1867_s13 = int_to_ptr.vmem [resolvable:$true] %s1134_s13 }
  0x3a   :  { %1307 = vmatpush3.bf16.msra.mxu0 %v1373_v0  ;;  %1354 = vmatpush3.bf16.msra.mxu1 %v1373_v0  ;;  %v1377_v5 = vld [vmem:[%s1925_s1 + $0x20] sm:$0xff]   ;;  %v1387_v6 = vld [vmem:[#allocation10 + $0x30] sm:$0xff]   ;;  %v1378_v7 = vld [vmem:[%s1925_s1 + $0x28] sm:$0xff]  }
  0x3b   :  { %1308 = vmatprep.subr.bf16.mxu0 %v1374_v1  ;;  %1347 = vmatprep.subr.bf16.mxu1 %v1374_v1  ;;  %v1379_v8 = vld [vmem:[%s1925_s1 + $0x30] sm:$0xff]   ;;  %v77_v9 = vld [vmem:[%s1926_s2] sm:$0x1]  ;;  %v1380_v11 = vld [vmem:[%s1925_s1 + $0x38] sm:$0xff]  }
  0x3c   :  { %1322 = vmatprep.mubr.bf16.mxu0 %v1381_v4  ;;  %1334 = vmatprep.mubr.bf16.mxu1 %v1387_v6  ;;  %v78_v10 = vand.u32 2147483647, %v77_v9  ;;  %v1382_v12 = vld [vmem:[#allocation10 + $0x8] sm:$0xff]   ;;  %v1388_v13 = vld [vmem:[#allocation10 + $0x38] sm:$0xff]   ;;  %v1383_v14 = vld [vmem:[#allocation10 + $0x10] sm:$0xff]  }
  0x3d   :  { %v1389_v15 = vld [vmem:[#allocation10 + $0x40] sm:$0xff]   ;;  %v1384_v19 = vld [vmem:[#allocation10 + $0x18] sm:$0xff]   ;;  %v1390_v20 = vld [vmem:[#allocation10 + $0x48] sm:$0xff]  }
  0x3e   :  { %1309 = vmatpush3.bf16.msra.mxu0 %v1374_v1  ;;  %1355 = vmatpush3.bf16.msra.mxu1 %v1374_v1  ;;  %1393 = vrcp.f32 %v78_v10  ;;  %v1385_v21 = vld [vmem:[#allocation10 + $0x20] sm:$0xff]   ;;  %v1391_v22 = vld [vmem:[#allocation10 + $0x50] sm:$0xff]   ;;  %v1386_v23 = vld [vmem:[#allocation10 + $0x28] sm:$0xff]  }
  0x3f   :  { %1310 = vmatprep.subr.bf16.mxu0 %v1375_v2  ;;  %1348 = vmatprep.subr.bf16.mxu1 %v1375_v2  ;;  %v1392_v24 = vld [vmem:[#allocation10 + $0x58] sm:$0xff]   ;;  %v103_v35 = vld [vmem:[#allocation15] sm:$0xff]  ;;  %v96_v38 = vld [vmem:[%s1928_s4 + $0x8] sm:$0xff] }
  0x40   :  { %v83_v27 = vld [vmem:[%s1927_s3] sm:$0x1]  ;;  %v99_v46 = vld [vmem:[#allocation13] sm:$0xff]  ;;  %v100_v50 = vld [vmem:[#allocation13 + $0x8] sm:$0xff] }
  0x41   :  { %v84_v28 = vand.u32 2147483647, %v83_v27  ;;  %v95_v34 = vld [vmem:[%s1928_s4] sm:$0xff]  ;;  %s1549_s4 = smov [#allocation16]  }
  0x42   :  { %1311 = vmatpush3.bf16.msra.mxu0 %v1375_v2  ;;  %1356 = vmatpush3.bf16.msra.mxu1 %v1375_v2  ;;  %v104_v39 = vld [vmem:[#allocation15 + $0x8] sm:$0xff]  ;;  %s1110_s29 = sshll.u32 %s1549_s4, 4  ;;  %s1111_s29 = int_to_ptr.vmem [resolvable:$true] %s1110_s29 }
  0x43   :  { %1312 = vmatprep.subr.bf16.mxu0 %v1376_v3  ;;  %1349 = vmatprep.subr.bf16.mxu1 %v1376_v3  ;;  %s1467_s6 = scalar_lea.vmem %s1111_s29, 1536  ;;  %p1472_p11 = scmp.lt.s32.totalorder %s1111_s29, %s1111_s29 }
  0x44   :  { %p1468_p10 = scmp.ne.s32.totalorder %s1111_s29, %s1467_s6  ;;  %p1473_p12 = scmp.lt.s32.totalorder %s1467_s6, %s1467_s6 }
  0x46   :  { %1313 = vmatpush3.bf16.msra.mxu0 %v1376_v3  ;;  %1357 = vmatpush3.bf16.msra.mxu1 %v1376_v3  ;;  %p1474_p13 = por %p1473_p12, %p1472_p11 }
  0x47   :  { %1314 = vmatprep.subr.bf16.mxu0 %v1377_v5  ;;  %1350 = vmatprep.subr.bf16.mxu1 %v1377_v5 }
  0x48   :  { %v1394_v16 = vpop.eup %1393  ;;  %p1475_p0 = pnand %p1474_p13, %p1468_p10 }
  0x49   :  { %v80_v17 = vmul.f32 -1.0, %v1394_v16 }
  0x4a   :  { %1315 = vmatpush3.bf16.msra.mxu0 %v1377_v5  ;;  %1358 = vmatpush3.bf16.msra.mxu1 %v1377_v5 }
  0x4b   :  { %1316 = vmatprep.subr.bf16.mxu0 %v1378_v7  ;;  %1351 = vmatprep.subr.bf16.mxu1 %v1378_v7  ;;  %v81_v18 = vmul.f32 1.442695, %v80_v17 }
  0x4d   :  { %1395 = vpow2.f32 %v81_v18 }
  0x4e   :  { %1317 = vmatpush3.bf16.msra.mxu0 %v1378_v7  ;;  %1359 = vmatpush3.bf16.msra.mxu1 %v1378_v7  ;;  %1397 = vrcp.f32 %v84_v28 }
  0x4f   :  { %1318 = vmatprep.subr.bf16.mxu0 %v1379_v8  ;;  %1352 = vmatprep.subr.bf16.mxu1 %v1379_v8 }
  0x52   :  { %1319 = vmatpush3.bf16.msra.mxu0 %v1379_v8  ;;  %1360 = vmatpush3.bf16.msra.mxu1 %v1379_v8 }
  0x53   :  { %1320 = vmatprep.subr.bf16.mxu0 %v1380_v11  ;;  %1353 = vmatprep.subr.bf16.mxu1 %v1380_v11 }
  0x56   :  { %1321 = vmatpush3.bf16.msra.mxu0 %v1380_v11  ;;  %1361 = vmatpush3.bf16.msra.mxu1 %v1380_v11 }
  0x57   :  { %v1396_v25 = vpop.eup %1395 }
  0x58   :  { %v90_v26 = vsub.f32 1.0, %v1396_v25  ;;  %89 = vst [vmem:[#allocation2] sm:$0x1] %v1396_v25  ;;  %v1398_v29 = vpop.eup %1397 }
  0x59   :  { %1323 = vmatmul.mubr.bf16.vlgmr.msra.gmra.mrb[0].mxu0 %v1382_v12  ;;  %1335 = vmatmul.mubr.bf16.vlgmr.msra.gmra.mrb[0].mxu1 %v1388_v13  ;;  %v86_v30 = vmul.f32 -1.0, %v1398_v29  ;;  %v1548_v13 = vmov 0.0  }
  0x5a   :  { %1326 = vmatprep.mubr.bf16.mxu0 %v1383_v14  ;;  %1338 = vmatprep.mubr.bf16.mxu1 %v1389_v15  ;;  %91 = vst [vmem:[#allocation3] sm:$0x1] %v90_v26 }
  0x5b   :  { %v87_v31 = vmul.f32 1.442695, %v86_v30 }
  0x5d   :  { %1399 = vpow2.f32 %v87_v31 }
  0x5f   :  { %v1691_v47 = vld [vmem:[#allocation2] ss:$0 sm:$0xff] }
  0x60   :  { %v458_v52 = vmul.f32 %v1691_v47, %v99_v46  ;;  %v459_v61 = vmul.f32 %v1691_v47, %v100_v50 }
  0x61   :  { %1327 = vmatmul.mubr.bf16.gmra.mrb[4].mxu0 %v1384_v19  ;;  %1339 = vmatmul.mubr.bf16.gmra.mrb[4].mxu1 %v1390_v20  ;;  %v1693_v49 = vld [vmem:[#allocation3] ss:$0 sm:$0xff] }
  0x62   :  { %1330 = vmatprep.mubr.bf16.mxu0 %v1385_v21  ;;  %1342 = vmatprep.mubr.bf16.mxu1 %v1391_v22 }
  0x67   :  { %v1400_v32 = vpop.eup %1399 }
  0x68   :  { %92 = vst [vmem:[#allocation4] sm:$0x1] %v1400_v32  ;;  %v93_v33 = vsub.f32 1.0, %v1400_v32 }
  0x69   :  { %1331 = vmatmul.mubr.bf16.gmra.mrb[8].mxu0 %v1386_v23  ;;  %1343 = vmatmul.mubr.bf16.gmra.mrb[8].mxu1 %v1392_v24 }
  0x6a   :  { %94 = vst [vmem:[#allocation5] sm:$0x1] %v93_v33 }
  0x6f   :  { %v1680_v36 = vld [vmem:[#allocation4] ss:$0 sm:$0xff] }
  0x70   :  { %v436_v40 = vmul.f32 %v1680_v36, %v103_v35  ;;  %v437_v42 = vmul.f32 %v1680_v36, %v104_v39 }
  0x71   :  { %v1682_v37 = vld [vmem:[#allocation5] ss:$0 sm:$0xff] }
  0x72   :  { %v444_v41 = vmul.f32 %v1682_v37, %v95_v34  ;;  %v445_v43 = vmul.f32 %v1682_v37, %v96_v38 }
  0x74   :  { %v446_v44 = vadd.f32 %v444_v41, %v436_v40  ;;  %v447_v45 = vadd.f32 %v445_v43, %v437_v42 }
  0x76   :  { %v448_v48 = vmul.f32 1.8, %v446_v44  ;;  %v449_v53 = vmul.f32 1.8, %v447_v45  ;;  %v506_v9 = vmul.f32 %v1680_v36, %v446_v44  ;;  %v507_v23 = vmul.f32 %v1680_v36, %v447_v45 }
  0x78   :  { %v450_v58 = vadd.f32 0.01, %v448_v48  ;;  %v451_v4 = vadd.f32 0.01, %v449_v53 }
 0x12c   :  { %v1324_v51 = vpop.f32.mrb[0].mxu0  ;;  %v1336_v54 = vpop.f32.mrb[0].mxu1 }
 0x12d   :  { %v301_v55 = vpop.f32.mrb[1].mxu0  ;;  %v1697_v56 = vmul.f32 %v1336_v54, %v1693_v49  ;;  %v349_v57 = vpop.f32.mrb[1].mxu1  ;;  %v521_v34 = vmul.f32 %v1324_v51, %v1693_v49 }
 0x12e   :  { %v468_v59 = vmul.f32 %v1693_v49, %v301_v55  ;;  %v1325_v60 = vpop.f32.mrb[2].mxu0  ;;  %v1702_v62 = vmul.f32 %v1693_v49, %v349_v57  ;;  %v1337_v63 = vpop.f32.mrb[2].mxu1 }
 0x12f   :  { %v304_v0 = vpop.f32.mrb[3].mxu0  ;;  %v1705_v1 = vmul.f32 %v1337_v63, %v1693_v49  ;;  %v352_v2 = vpop.f32.mrb[3].mxu1  ;;  %v522_v41 = vmul.f32 %v1325_v60, %v1693_v49 }
 0x130   :  { %v470_v3 = vadd.f32 %v468_v59, %v458_v52  ;;  %v469_v5 = vmul.f32 %v1693_v49, %v304_v0  ;;  %v1709_v6 = vmul.f32 %v1693_v49, %v352_v2 }
 0x132   :  { %v472_v7 = vsub.f32 %v470_v3, %v450_v58  ;;  %v471_v8 = vadd.f32 %v469_v5, %v459_v61 }
 0x134   :  { %vm474_vm0 = vcmp.gt.f32.partialorder %v472_v7, 0.0  ;;  %v473_v10 = vsub.f32 %v471_v8, %v451_v4  ;;  %v1712_v11 = vpop.f32.mrb[4].mxu0  ;;  %v1340_v12 = vpop.f32.mrb[4].mxu1 }
 0x135   :  { %v1178_v14 = vsel %vm474_vm0, 1.0, %v1548_v13  ;;  %v317_v15 = vpop.f32.mrb[5].mxu0  ;;  %v1716_v16 = vmul.f32 %v1340_v12, %v1693_v49  ;;  %v365_v17 = vpop.f32.mrb[5].mxu1 }
 0x136   :  { %v480_v18 = vmul.f32 %v1178_v14, %v450_v58  ;;  %v508_v19 = vmul.f32 %v1178_v14, %v1682_v37  ;;  %vm475_vm1 = vcmp.gt.f32.partialorder %v473_v10, 0.0  ;;  %v1719_v20 = vpop.f32.mrb[6].mxu0  ;;  %v1341_v21 = vpop.f32.mrb[6].mxu1  ;;  %v1724_v25 = vmul.f32 %v1693_v49, %v365_v17 }
 0x137   :  { %v1179_v22 = vsel %vm475_vm1, 1.0, %v1548_v13  ;;  %v320_v24 = vpop.f32.mrb[7].mxu0  ;;  %v1727_v26 = vmul.f32 %v1341_v21, %v1693_v49  ;;  %v368_v27 = vpop.f32.mrb[7].mxu1  ;;  %v575_v10 = vmul.f32 %v1693_v49, %v317_v15 }
 0x138   :  { %v482_v28 = vsub.f32 %v470_v3, %v480_v18  ;;  %v510_v29 = vadd.f32 %v508_v19, %v506_v9  ;;  %v481_v30 = vmul.f32 %v1179_v22, %v451_v4  ;;  %v1251_v31 = vpack.c.bf16 %v1179_v22, %v1178_v14 }
 0x139   :  { %v509_v32 = vmul.f32 %v1179_v22, %v1682_v37  ;;  %v1731_v33 = vmul.f32 %v1693_v49, %v368_v27  ;;  %v576_v15 = vmul.f32 %v1693_v49, %v320_v24 }
 0x13a   :  { %v516_v35 = vmul.f32 %v1691_v47, %v482_v28  ;;  %v483_v38 = vsub.f32 %v471_v8, %v481_v30  ;;  %1252 = vst [vmem:[#allocation16] sm:$0xff] %v1251_v31   ;;  %v512_v39 = vmul.f32 1.8, %v510_v29  ;;  %v560_v5 = vmul.f32 %v1680_v36, %v510_v29 }
 0x13b   :  { %v511_v40 = vadd.f32 %v509_v32, %v507_v23 }
 0x13c   :  { %v517_v42 = vmul.f32 %v1691_v47, %v483_v38  ;;  %v514_v43 = vadd.f32 0.01, %v512_v39  ;;  %v523_v44 = vadd.f32 %v521_v34, %v516_v35  ;;  %v1737_v45 = vpop.f32.mrb[8].mxu0  ;;  %v1344_v46 = vpop.f32.mrb[8].mxu1 }
 0x13d   :  { %v513_v48 = vmul.f32 1.8, %v511_v40  ;;  %v1739_v50 = vpop.f32.mrb[9].mxu0  ;;  %v1742_v51 = vmul.f32 %v1344_v46, %v1693_v49  ;;  %v381_v52 = vpop.f32.mrb[9].mxu1  ;;  %v561_v18 = vmul.f32 %v1680_v36, %v511_v40 }
 0x13e   :  { %v525_v53 = vsub.f32 %v523_v44, %v514_v43  ;;  %v524_v54 = vadd.f32 %v522_v41, %v517_v42  ;;  %v1744_v55 = vpop.f32.mrb[10].mxu0  ;;  %v1747_v57 = vmul.f32 %v1693_v49, %v381_v52  ;;  %v1345_v58 = vpop.f32.mrb[10].mxu1 }
 0x13f   :  { %v515_v59 = vadd.f32 0.01, %v513_v48  ;;  %v1749_v60 = vpop.f32.mrb[11].mxu0  ;;  %v1752_v61 = vmul.f32 %v1345_v58, %v1693_v49  ;;  %v384_v63 = vpop.f32.mrb[11].mxu1 }
 0x140   :  { %vm527_vm2 = vcmp.gt.f32.partialorder %v525_v53, 0.0  ;;  %v1755_v0 = vmul.f32 %v1693_v49, %v384_v63 }
 0x141   :  { %v1182_v2 = vsel %vm527_vm2, 1.0, %v1548_v13  ;;  %v526_v3 = vsub.f32 %v524_v54, %v515_v59 }
 0x142   :  { %v533_v4 = vmul.f32 %v1182_v2, %v514_v43  ;;  %v562_v7 = vmul.f32 %v1182_v2, %v1682_v37 }
 0x143   :  { %vm528_vm3 = vcmp.gt.f32.partialorder %v526_v3, 0.0 }
 0x144   :  { %v535_v8 = vsub.f32 %v523_v44, %v533_v4  ;;  %v564_v9 = vadd.f32 %v562_v7, %v560_v5  ;;  %v1183_v12 = vsel %vm528_vm3, 1.0, %v1548_v13  ;;  %v630_v5 = vmul.f32 %v1719_v20, %v1693_v49 }
 0x145   :  { %v534_v14 = vmul.f32 %v1183_v12, %v515_v59  ;;  %v1254_v17 = vpack.c.bf16 %v1183_v12, %v1182_v2  ;;  %v563_v19 = vmul.f32 %v1183_v12, %v1682_v37  ;;  %v683_v20 = vmul.f32 %v1693_v49, %v1739_v50 }
 0x146   :  { %v566_v21 = vmul.f32 1.8, %v564_v9  ;;  %v570_v22 = vmul.f32 %v1691_v47, %v535_v8  ;;  %v614_v41 = vmul.f32 %v1680_v36, %v564_v9  ;;  %v684_v50 = vmul.f32 %v1693_v49, %v1749_v60 }
 0x147   :  { %v536_v23 = vsub.f32 %v524_v54, %v534_v14  ;;  %1255 = vst [vmem:[#allocation16 + $0x8] sm:$0xff] %v1254_v17   ;;  %v565_v27 = vadd.f32 %v563_v19, %v561_v18  ;;  %v629_v54 = vmul.f32 %v1712_v11, %v1693_v49 }
 0x148   :  { %v568_v28 = vadd.f32 0.01, %v566_v21  ;;  %v577_v29 = vadd.f32 %v575_v10, %v570_v22 }
 0x149   :  { %v567_v30 = vmul.f32 1.8, %v565_v27  ;;  %v571_v31 = vmul.f32 %v1691_v47, %v536_v23  ;;  %v615_v24 = vmul.f32 %v1680_v36, %v565_v27 }
 0x14a   :  { %v579_v32 = vsub.f32 %v577_v29, %v568_v28 }
 0x14b   :  { %v569_v34 = vadd.f32 0.01, %v567_v30  ;;  %v578_v35 = vadd.f32 %v576_v15, %v571_v31 }
 0x14c   :  { %vm581_vm4 = vcmp.gt.f32.partialorder %v579_v32, 0.0 }
 0x14d   :  { %v1186_v38 = vsel %vm581_vm4, 1.0, %v1548_v13  ;;  %v580_v39 = vsub.f32 %v578_v35, %v569_v34 }
 0x14e   :  { %v587_v40 = vmul.f32 %v1186_v38, %v568_v28  ;;  %v616_v42 = vmul.f32 %v1186_v38, %v1682_v37 }
 0x14f   :  { %vm582_vm5 = vcmp.gt.f32.partialorder %v580_v39, 0.0 }
 0x150   :  { %v589_v43 = vsub.f32 %v577_v29, %v587_v40  ;;  %v618_v44 = vadd.f32 %v616_v42, %v614_v41  ;;  %v1187_v46 = vsel %vm582_vm5, 1.0, %v1548_v13 }
 0x151   :  { %v588_v48 = vmul.f32 %v1187_v46, %v569_v34  ;;  %v1257_v52 = vpack.c.bf16 %v1187_v46, %v1186_v38  ;;  %v617_v53 = vmul.f32 %v1187_v46, %v1682_v37 }
 0x152   :  { %v624_v58 = vmul.f32 %v1691_v47, %v589_v43  ;;  %v620_v59 = vmul.f32 1.8, %v618_v44  ;;  %v668_v18 = vmul.f32 %v1680_v36, %v618_v44 }
 0x153   :  { %v590_v63 = vsub.f32 %v578_v35, %v588_v48  ;;  %1258 = vst [vmem:[#allocation16 + $0x10] sm:$0xff] %v1257_v52   ;;  %v619_v2 = vadd.f32 %v617_v53, %v615_v24 }
 0x154   :  { %v622_v3 = vadd.f32 0.01, %v620_v59  ;;  %v631_v4 = vadd.f32 %v629_v54, %v624_v58 }
 0x155   :  { %v625_v7 = vmul.f32 %v1691_v47, %v590_v63  ;;  %v621_v8 = vmul.f32 1.8, %v619_v2  ;;  %v669_v29 = vmul.f32 %v1680_v36, %v619_v2 }
 0x156   :  { %v633_v9 = vsub.f32 %v631_v4, %v622_v3 }
 0x157   :  { %v623_v10 = vadd.f32 0.01, %v621_v8  ;;  %v632_v12 = vadd.f32 %v630_v5, %v625_v7 }
 0x158   :  { %vm635_vm6 = vcmp.gt.f32.partialorder %v633_v9, 0.0 }
 0x159   :  { %v1190_v11 = vsel %vm635_vm6, 1.0, %v1548_v13  ;;  %v634_v14 = vsub.f32 %v632_v12, %v623_v10 }
 0x15a   :  { %v641_v17 = vmul.f32 %v1190_v11, %v622_v3  ;;  %v670_v19 = vmul.f32 %v1190_v11, %v1682_v37  ;;  %v737_v3 = vmul.f32 %v1737_v45, %v1693_v49 }
 0x15b   :  { %vm636_vm7 = vcmp.gt.f32.partialorder %v634_v14, 0.0 }
 0x15c   :  { %v643_v21 = vsub.f32 %v631_v4, %v641_v17  ;;  %v672_v22 = vadd.f32 %v670_v19, %v668_v18  ;;  %v1191_v23 = vsel %vm636_vm7, 1.0, %v1548_v13 }
 0x15d   :  { %v642_v27 = vmul.f32 %v1191_v23, %v623_v10  ;;  %v1260_v28 = vpack.c.bf16 %v1191_v23, %v1190_v11  ;;  %v671_v30 = vmul.f32 %v1191_v23, %v1682_v37 }
 0x15e   :  { %v674_v31 = vmul.f32 1.8, %v672_v22  ;;  %v678_v15 = vmul.f32 %v1691_v47, %v643_v21  ;;  %v722_v52 = vmul.f32 %v1680_v36, %v672_v22 }
 0x15f   :  { %v644_v32 = vsub.f32 %v632_v12, %v642_v27  ;;  %1261 = vst [vmem:[#allocation16 + $0x18] sm:$0xff] %v1260_v28   ;;  %v673_v34 = vadd.f32 %v671_v30, %v669_v29  ;;  %v738_v12 = vmul.f32 %v1744_v55, %v1693_v49 }
 0x160   :  { %v676_v35 = vadd.f32 0.01, %v674_v31  ;;  %v685_v38 = vadd.f32 %v683_v20, %v678_v15 }
 0x161   :  { %v675_v39 = vmul.f32 1.8, %v673_v34  ;;  %v679_v40 = vmul.f32 %v1691_v47, %v644_v32  ;;  %v723_v60 = vmul.f32 %v1680_v36, %v673_v34 }
 0x162   :  { %v687_v41 = vsub.f32 %v685_v38, %v676_v35 }
 0x163   :  { %v677_v42 = vadd.f32 0.01, %v675_v39  ;;  %v686_v43 = vadd.f32 %v684_v50, %v679_v40 }
 0x164   :  { %vm689_vm8 = vcmp.gt.f32.partialorder %v687_v41, 0.0 }
 0x165   :  { %v1194_v44 = vsel %vm689_vm8, 1.0, %v1548_v13  ;;  %v688_v46 = vsub.f32 %v686_v43, %v677_v42 }
 0x166   :  { %v695_v48 = vmul.f32 %v1194_v44, %v676_v35  ;;  %v724_v24 = vmul.f32 %v1194_v44, %v1682_v37 }
 0x167   :  { %vm690_vm9 = vcmp.gt.f32.partialorder %v688_v46, 0.0 }
 0x168   :  { %v697_v53 = vsub.f32 %v685_v38, %v695_v48  ;;  %v726_v54 = vadd.f32 %v724_v24, %v722_v52  ;;  %v1195_v58 = vsel %vm690_vm9, 1.0, %v1548_v13 }
 0x169   :  { %v696_v59 = vmul.f32 %v1195_v58, %v677_v42  ;;  %v1263_v63 = vpack.c.bf16 %v1195_v58, %v1194_v44  ;;  %v725_v2 = vmul.f32 %v1195_v58, %v1682_v37 }
 0x16a   :  { %v732_v4 = vmul.f32 %v1691_v47, %v697_v53  ;;  %v728_v5 = vmul.f32 1.8, %v726_v54  ;;  %v776_v20 = vmul.f32 %v1680_v36, %v726_v54 }
 0x16b   :  { %v698_v7 = vsub.f32 %v686_v43, %v696_v59  ;;  %1264 = vst [vmem:[#allocation16 + $0x20] sm:$0xff] %v1263_v63   ;;  %v727_v8 = vadd.f32 %v725_v2, %v723_v60 }
 0x16c   :  { %v730_v9 = vadd.f32 0.01, %v728_v5  ;;  %v739_v10 = vadd.f32 %v737_v3, %v732_v4 }
 0x16d   :  { %v733_v11 = vmul.f32 %v1691_v47, %v698_v7  ;;  %v729_v14 = vmul.f32 1.8, %v727_v8  ;;  %v777_v30 = vmul.f32 %v1680_v36, %v727_v8 }
 0x16e   :  { %v741_v17 = vsub.f32 %v739_v10, %v730_v9 }
 0x16f   :  { %v731_v18 = vadd.f32 0.01, %v729_v14  ;;  %v740_v19 = vadd.f32 %v738_v12, %v733_v11 }
 0x170   :  { %vm743_vm10 = vcmp.gt.f32.partialorder %v741_v17, 0.0 }
 0x171   :  { %v1198_v45 = vsel %vm743_vm10, 1.0, %v1548_v13  ;;  %v742_v21 = vsub.f32 %v740_v19, %v731_v18 }
 0x172   :  { %v749_v22 = vmul.f32 %v1198_v45, %v730_v9  ;;  %v778_v23 = vmul.f32 %v1198_v45, %v1682_v37 }
 0x173   :  { %vm744_vm11 = vcmp.gt.f32.partialorder %v742_v21, 0.0 }
 0x174   :  { %v751_v27 = vsub.f32 %v739_v10, %v749_v22  ;;  %v780_v28 = vadd.f32 %v778_v23, %v776_v20  ;;  %v1199_v49 = vsel %vm744_vm11, 1.0, %v1548_v13 }
 0x175   :  { %v750_v55 = vmul.f32 %v1199_v49, %v731_v18  ;;  %v1266_v29 = vpack.c.bf16 %v1199_v49, %v1198_v45  ;;  %v779_v31 = vmul.f32 %v1199_v49, %v1682_v37 }
 0x176   :  { %v782_v15 = vmul.f32 1.8, %v780_v28  ;;  %v786_v32 = vmul.f32 %v1691_v47, %v751_v27  ;;  %v830_v52 = vmul.f32 %v1680_v36, %v780_v28 }
 0x177   :  { %v752_v34 = vsub.f32 %v740_v19, %v750_v55  ;;  %1267 = vst [vmem:[#allocation16 + $0x28] sm:$0xff] %v1266_v29   ;;  %v781_v35 = vadd.f32 %v779_v31, %v777_v30 }
 0x178   :  { %v784_v38 = vadd.f32 0.01, %v782_v15  ;;  %v793_v39 = vadd.f32 %v1702_v62, %v786_v32 }
 0x179   :  { %v783_v40 = vmul.f32 1.8, %v781_v35  ;;  %v787_v50 = vmul.f32 %v1691_v47, %v752_v34  ;;  %v831_v63 = vmul.f32 %v1680_v36, %v781_v35 }
 0x17a   :  { %v795_v41 = vsub.f32 %v793_v39, %v784_v38 }
 0x17b   :  { %v785_v42 = vadd.f32 0.01, %v783_v40  ;;  %v794_v43 = vadd.f32 %v1709_v6, %v787_v50 }
 0x17c   :  { %vm797_vm12 = vcmp.gt.f32.partialorder %v795_v41, 0.0 }
 0x17d   :  { %v1202_v44 = vsel %vm797_vm12, 1.0, %v1548_v13  ;;  %v796_v46 = vsub.f32 %v794_v43, %v785_v42 }
 0x17e   :  { %v803_v48 = vmul.f32 %v1202_v44, %v784_v38  ;;  %v832_v24 = vmul.f32 %v1202_v44, %v1682_v37 }
 0x17f   :  { %vm798_vm13 = vcmp.gt.f32.partialorder %v796_v46, 0.0 }
 0x180   :  { %v805_v53 = vsub.f32 %v793_v39, %v803_v48  ;;  %v834_v54 = vadd.f32 %v832_v24, %v830_v52  ;;  %v1203_v62 = vsel %vm798_vm13, 1.0, %v1548_v13 }
 0x181   :  { %v804_v58 = vmul.f32 %v1203_v62, %v785_v42  ;;  %v1269_v59 = vpack.c.bf16 %v1203_v62, %v1202_v44  ;;  %v833_v6 = vmul.f32 %v1203_v62, %v1682_v37 }
 0x182   :  { %v840_v60 = vmul.f32 %v1691_v47, %v805_v53  ;;  %v836_v2 = vmul.f32 1.8, %v834_v54  ;;  %v884_v19 = vmul.f32 %v1680_v36, %v834_v54 }
 0x183   :  { %v806_v3 = vsub.f32 %v794_v43, %v804_v58  ;;  %1270 = vst [vmem:[#allocation16 + $0x30] sm:$0xff] %v1269_v59   ;;  %v835_v4 = vadd.f32 %v833_v6, %v831_v63 }
 0x184   :  { %v838_v5 = vadd.f32 0.01, %v836_v2  ;;  %v847_v7 = vadd.f32 %v1697_v56, %v840_v60 }
 0x185   :  { %v841_v8 = vmul.f32 %v1691_v47, %v806_v3  ;;  %v837_v9 = vmul.f32 1.8, %v835_v4  ;;  %v885_v27 = vmul.f32 %v1680_v36, %v835_v4 }
 0x186   :  { %v849_v10 = vsub.f32 %v847_v7, %v838_v5 }
 0x187   :  { %v839_v12 = vadd.f32 0.01, %v837_v9  ;;  %v848_v11 = vadd.f32 %v1705_v1, %v841_v8 }
 0x188   :  { %vm851_vm14 = vcmp.gt.f32.partialorder %v849_v10, 0.0 }
 0x189   :  { %v1206_v14 = vsel %vm851_vm14, 1.0, %v1548_v13  ;;  %v850_v17 = vsub.f32 %v848_v11, %v839_v12 }
 0x18a   :  { %v857_v18 = vmul.f32 %v1206_v14, %v838_v5  ;;  %v886_v45 = vmul.f32 %v1206_v14, %v1682_v37 }
 0x18b   :  { %vm852_vm15 = vcmp.gt.f32.partialorder %v850_v17, 0.0 }
 0x18c   :  { %v859_v21 = vsub.f32 %v847_v7, %v857_v18  ;;  %v888_v22 = vadd.f32 %v886_v45, %v884_v19  ;;  %v1207_v56 = vsel %vm852_vm15, 1.0, %v1548_v13 }
 0x18d   :  { %v858_v20 = vmul.f32 %v1207_v56, %v839_v12  ;;  %v1272_v23 = vpack.c.bf16 %v1207_v56, %v1206_v14  ;;  %v887_v1 = vmul.f32 %v1207_v56, %v1682_v37 }
 0x18e   :  { %v890_v28 = vmul.f32 1.8, %v888_v22  ;;  %v894_v49 = vmul.f32 %v1691_v47, %v859_v21  ;;  %v938_v41 = vmul.f32 %v1680_v36, %v888_v22 }
 0x18f   :  { %v860_v55 = vsub.f32 %v848_v11, %v858_v20  ;;  %1273 = vst [vmem:[#allocation16 + $0x38] sm:$0xff] %v1272_v23   ;;  %v889_v29 = vadd.f32 %v887_v1, %v885_v27 }
 0x190   :  { %v892_v30 = vadd.f32 0.01, %v890_v28  ;;  %v901_v31 = vadd.f32 %v1724_v25, %v894_v49 }
 0x191   :  { %v891_v15 = vmul.f32 1.8, %v889_v29  ;;  %v895_v32 = vmul.f32 %v1691_v47, %v860_v55  ;;  %v939_v52 = vmul.f32 %v1680_v36, %v889_v29 }
 0x192   :  { %v903_v34 = vsub.f32 %v901_v31, %v892_v30 }
 0x193   :  { %v893_v35 = vadd.f32 0.01, %v891_v15  ;;  %v902_v38 = vadd.f32 %v1731_v33, %v895_v32 }
 0x194   :  { %vm905_vm0 = vcmp.gt.f32.partialorder %v903_v34, 0.0 }
 0x195   :  { %v1210_v39 = vsel %vm905_vm0, 1.0, %v1548_v13  ;;  %v904_v40 = vsub.f32 %v902_v38, %v893_v35 }
 0x196   :  { %v911_v50 = vmul.f32 %v1210_v39, %v892_v30  ;;  %v940_v42 = vmul.f32 %v1210_v39, %v1682_v37 }
 0x197   :  { %vm906_vm1 = vcmp.gt.f32.partialorder %v904_v40, 0.0 }
 0x198   :  { %v913_v43 = vsub.f32 %v901_v31, %v911_v50  ;;  %v942_v44 = vadd.f32 %v940_v42, %v938_v41  ;;  %v1211_v25 = vsel %vm906_vm1, 1.0, %v1548_v13 }
 0x199   :  { %v912_v46 = vmul.f32 %v1211_v25, %v893_v35  ;;  %v1275_v48 = vpack.c.bf16 %v1211_v25, %v1210_v39  ;;  %v941_v33 = vmul.f32 %v1211_v25, %v1682_v37 }
 0x19a   :  { %v948_v24 = vmul.f32 %v1691_v47, %v913_v43  ;;  %v944_v53 = vmul.f32 1.8, %v942_v44  ;;  %v992_v8 = vmul.f32 %v1680_v36, %v942_v44 }
 0x19b   :  { %v914_v54 = vsub.f32 %v902_v38, %v912_v46  ;;  %1276 = vst [vmem:[#allocation16 + $0x40] sm:$0xff] %v1275_v48   ;;  %v943_v62 = vadd.f32 %v941_v33, %v939_v52 }
 0x19c   :  { %v946_v58 = vadd.f32 0.01, %v944_v53  ;;  %v955_v59 = vadd.f32 %v1716_v16, %v948_v24 }
 0x19d   :  { %v949_v63 = vmul.f32 %v1691_v47, %v914_v54  ;;  %v945_v6 = vmul.f32 1.8, %v943_v62  ;;  %v993_v17 = vmul.f32 %v1680_v36, %v943_v62 }
 0x19e   :  { %v957_v60 = vsub.f32 %v955_v59, %v946_v58 }
 0x19f   :  { %v947_v2 = vadd.f32 0.01, %v945_v6  ;;  %v956_v3 = vadd.f32 %v1727_v26, %v949_v63 }
 0x1a0   :  { %vm959_vm2 = vcmp.gt.f32.partialorder %v957_v60, 0.0 }
 0x1a1   :  { %v1214_v4 = vsel %vm959_vm2, 1.0, %v1548_v13  ;;  %v958_v5 = vsub.f32 %v956_v3, %v947_v2 }
 0x1a2   :  { %v965_v7 = vmul.f32 %v1214_v4, %v946_v58  ;;  %v994_v9 = vmul.f32 %v1214_v4, %v1682_v37 }
 0x1a3   :  { %vm960_vm3 = vcmp.gt.f32.partialorder %v958_v5, 0.0 }
 0x1a4   :  { %v967_v10 = vsub.f32 %v955_v59, %v965_v7  ;;  %v996_v12 = vadd.f32 %v994_v9, %v992_v8  ;;  %v1215_v16 = vsel %vm960_vm3, 1.0, %v1548_v13 }
 0x1a5   :  { %v966_v11 = vmul.f32 %v1215_v16, %v947_v2  ;;  %v1278_v14 = vpack.c.bf16 %v1215_v16, %v1214_v4  ;;  %v995_v26 = vmul.f32 %v1215_v16, %v1682_v37 }
 0x1a6   :  { %v998_v18 = vmul.f32 1.8, %v996_v12  ;;  %v1002_v19 = vmul.f32 %v1691_v47, %v967_v10  ;;  %v1046_v30 = vmul.f32 %v1680_v36, %v996_v12 }
 0x1a7   :  { %v968_v45 = vsub.f32 %v956_v3, %v966_v11  ;;  %1279 = vst [vmem:[#allocation16 + $0x48] sm:$0xff] %v1278_v14   ;;  %v997_v21 = vadd.f32 %v995_v26, %v993_v17 }
 0x1a8   :  { %v1000_v22 = vadd.f32 0.01, %v998_v18  ;;  %v1009_v56 = vadd.f32 %v1747_v57, %v1002_v19 }
 0x1a9   :  { %v999_v20 = vmul.f32 1.8, %v997_v21  ;;  %v1003_v23 = vmul.f32 %v1691_v47, %v968_v45  ;;  %v1047_v38 = vmul.f32 %v1680_v36, %v997_v21 }
 0x1aa   :  { %v1011_v27 = vsub.f32 %v1009_v56, %v1000_v22 }
 0x1ab   :  { %v1001_v1 = vadd.f32 0.01, %v999_v20  ;;  %v1010_v28 = vadd.f32 %v1755_v0, %v1003_v23 }
 0x1ac   :  { %vm1013_vm4 = vcmp.gt.f32.partialorder %v1011_v27, 0.0 }
 0x1ad   :  { %v1218_v49 = vsel %vm1013_vm4, 1.0, %v1548_v13  ;;  %v1012_v55 = vsub.f32 %v1010_v28, %v1001_v1 }
 0x1ae   :  { %v1019_v29 = vmul.f32 %v1218_v49, %v1000_v22  ;;  %v1048_v31 = vmul.f32 %v1218_v49, %v1682_v37 }
 0x1af   :  { %vm1014_vm5 = vcmp.gt.f32.partialorder %v1012_v55, 0.0 }
 0x1b0   :  { %v1021_v15 = vsub.f32 %v1009_v56, %v1019_v29  ;;  %v1050_v32 = vadd.f32 %v1048_v31, %v1046_v30  ;;  %v1219_v57 = vsel %vm1014_vm5, 1.0, %v1548_v13 }
 0x1b1   :  { %v1020_v34 = vmul.f32 %v1219_v57, %v1001_v1  ;;  %v1281_v35 = vpack.c.bf16 %v1219_v57, %v1218_v49  ;;  %v1049_v0 = vmul.f32 %v1219_v57, %v1682_v37 }
 0x1b2   :  { %v1056_v39 = vmul.f32 %v1691_v47, %v1021_v15  ;;  %1103 = vst [vmem:[#allocation19] sm:$0xff] %v1050_v32  ;;  %v1052_v40 = vmul.f32 1.8, %v1050_v32 }
 0x1b3   :  { %v1022_v50 = vsub.f32 %v1010_v28, %v1020_v34  ;;  %1282 = vst [vmem:[#allocation16 + $0x50] sm:$0xff] %v1281_v35   ;;  %v1051_v41 = vadd.f32 %v1049_v0, %v1047_v38 }
 0x1b4   :  { %v1054_v42 = vadd.f32 0.01, %v1052_v40  ;;  %v1063_v43 = vadd.f32 %v1742_v51, %v1056_v39 }
 0x1b5   :  { %v1057_v44 = vmul.f32 %v1691_v47, %v1022_v50  ;;  %1104 = vst [vmem:[#allocation19 + $0x8] sm:$0xff] %v1051_v41  ;;  %v1053_v25 = vmul.f32 1.8, %v1051_v41 }
 0x1b6   :  { %v1065_v46 = vsub.f32 %v1063_v43, %v1054_v42 }
 0x1b7   :  { %v1055_v48 = vadd.f32 0.01, %v1053_v25  ;;  %v1064_v36 = vadd.f32 %v1752_v61, %v1057_v44 }
 0x1b8   :  { %vm1067_vm6 = vcmp.gt.f32.partialorder %v1065_v46, 0.0 }
 0x1b9   :  { %v1066_v37 = vsub.f32 %v1064_v36, %v1055_v48  ;;  %v1222_v52 = vsel %vm1067_vm6, 1.0, %v1548_v13 }
 0x1ba   :  { %v1073_v33 = vmul.f32 %v1222_v52, %v1054_v42 }
 0x1bb   :  { %vm1068_vm7 = vcmp.gt.f32.partialorder %v1066_v37, 0.0 }
 0x1bc   :  { %v1223_v24 = vsel %vm1068_vm7, 1.0, %v1548_v13  ;;  %v1075_v53 = vsub.f32 %v1063_v43, %v1073_v33 }
 0x1bd   :  { %v1074_v47 = vmul.f32 %v1223_v24, %v1055_v48  ;;  %v1284_v51 = vpack.c.bf16 %v1223_v24, %v1222_v52 }
 0x1be   :  { %1099 = vst [vmem:[#allocation17] sm:$0xff] %v1075_v53 }
 0x1bf   :  { %v1076_v61 = vsub.f32 %v1064_v36, %v1074_v47  ;;  %1285 = vst [vmem:[#allocation16 + $0x58] sm:$0xff] %v1284_v51  }
 0x1c0   :  { %1478 = shalt.err (!%p1475_p0)
}
 0x1c1   :  { %s1479_s16 = scalar_lea.hbm %s1931_s7, 1536 }
 0x1c2   :  { %p1480_p1 = scmp.ne.s32.totalorder %s1931_s7, %s1479_s16  ;;  %p1483_p2 = scmp.lt.u32.totalorder %s1479_s16, %s1931_s7 }
 0x1c4   :  { %p1485_p3 = pnand %p1483_p2, %p1480_p1 }
 0x1c6   :  { %1488 = shalt.err (!%p1485_p3)
}
 0x1c7   :  { %1116 = dma.vmem_to_hbm [thread:$0]  %s1111_s29, 1536, %s1931_s7, [#allocation12], %s1545_s5, %s1545_s5, %s1546_s10   ;;  %1100 = vst [vmem:[#allocation17 + $0x8] sm:$0xff] %v1076_v61 }
 0x1c8   :  { %s1489_s26 = scalar_lea.vmem %s1865_s11, 256  ;;  %p1494_p5 = scmp.lt.s32.totalorder %s1865_s11, %s1865_s11 }
 0x1c9   :  { %p1490_p4 = scmp.ne.s32.totalorder %s1865_s11, %s1489_s26  ;;  %p1495_p6 = scmp.lt.s32.totalorder %s1489_s26, %s1489_s26 }
 0x1cb   :  { %p1496_p7 = por %p1495_p6, %p1494_p5 }
 0x1cd   :  { %p1497_p8 = pnand %p1496_p7, %p1490_p4 }
 0x1cf   :  { %1500 = shalt.err (!%p1497_p8)
}
 0x1d0   :  { %s1501_s2 = scalar_lea.hbm %s1932_s8, 256 }
 0x1d1   :  { %p1502_p9 = scmp.ne.s32.totalorder %s1932_s8, %s1501_s2  ;;  %p1505_p10 = scmp.lt.u32.totalorder %s1501_s2, %s1932_s8 }
 0x1d3   :  { %p1507_p11 = pnand %p1505_p10, %p1502_p9 }
 0x1d5   :  { %1510 = shalt.err (!%p1507_p11)
}
 0x1d6   :  { %1128 = dma.vmem_to_hbm [thread:$0]  %s1865_s11, 256, %s1932_s8, [#allocation18], %s1542_s19, %s1542_s19, %s1543_s20  }
 0x1d7   :  { %s1511_s10 = scalar_lea.vmem %s1867_s13, 256  ;;  %p1516_p13 = scmp.lt.s32.totalorder %s1867_s13, %s1867_s13 }
 0x1d8   :  { %p1512_p12 = scmp.ne.s32.totalorder %s1867_s13, %s1511_s10  ;;  %p1517_p0 = scmp.lt.s32.totalorder %s1511_s10, %s1511_s10 }
 0x1da   :  { %p1518_p1 = por %p1517_p0, %p1516_p13 }
 0x1dc   :  { %p1519_p2 = pnand %p1518_p1, %p1512_p12 }
 0x1de   :  { %1522 = shalt.err (!%p1519_p2)
}
 0x1df   :  { %s1523_s30 = scalar_lea.hbm %s1933_s9, 256 }
 0x1e0   :  { %p1524_p3 = scmp.ne.s32.totalorder %s1933_s9, %s1523_s30  ;;  %p1527_p4 = scmp.lt.u32.totalorder %s1523_s30, %s1933_s9 }
 0x1e2   :  { %p1529_p5 = pnand %p1527_p4, %p1524_p3 }
 0x1e4   :  { %1532 = shalt.err (!%p1529_p5)
}
 0x1e5   :  { %1140 = dma.vmem_to_hbm [thread:$0]  %s1867_s13, 256, %s1933_s9, [#allocation18], %s1542_s19, %s1542_s19, %s1543_s20  }
 0x1e6   :  { %1537 = dma.done.wait [#allocation12], 1536  }
 0x1e7   :  { %1538 = vsyncadd [#allocation12], 4294965760 }
 0x1e8   :  { %1539 = dma.done.wait [#allocation18], 512  }
 0x1e9   :  { %1540 = vsyncadd [#allocation18], 4294966784 }
 0x1ea   :  { %1150 = vsyncpa [#allocation11], 1 }
 0x1eb   :  { %1151 = vsyncpa [#allocation14], 1 }
 0x1ec   :  { %1152 = vsyncpa [#allocation12], 1 }
 0x1ed   :  { %1153 = vsyncpa [#allocation18], 1 }

</bundles_post_ra>
